<compile_context>
chip_gen: v7x
topology: tpu7x:2x2x1
jax: 0.10.0
libtpu: 0.0.40
codegen_flags: <defaults>
</compile_context>

<pallas_src>
import functools

import numpy as np

import jax
import jax.numpy as jnp
from jax.experimental import pallas as pl
from jax.experimental.pallas import tpu as pltpu


def _dropedge_kernel(n_cols_total, row_tile, col_tile, params_ref, adj_ref, out_ref):
    """One grid step = one (row_tile, col_tile) tile of the adjacency."""
    i = pl.program_id(0)
    j = pl.program_id(1)

    # Scalar-prefetched params (SMEM, int32 bit patterns): [seed, drop_threshold].
    seed = params_ref[0].astype(jnp.uint32)
    threshold = params_ref[1].astype(jnp.uint32)

    shape = adj_ref.shape
    row0 = (i * row_tile).astype(jnp.uint32)
    col0 = (j * col_tile).astype(jnp.uint32)
    r = jax.lax.broadcasted_iota(jnp.int32, shape, 0).astype(jnp.uint32) + row0
    c = jax.lax.broadcasted_iota(jnp.int32, shape, 1).astype(jnp.uint32) + col0

    # Counter-based per-edge randomness: global linear index mixed with the
    # seed, then avalanched with the murmur3 fmix32 finalizer. Depends only on
    # (seed, global index) -> identical mask for any tiling, and adjacent seeds
    # give uncorrelated masks.
    x = r * jnp.uint32(n_cols_total) + c
    x = x ^ (seed * jnp.uint32(0x9E3779B9))
    x = x ^ (x >> 16)
    x = x * jnp.uint32(0x85EBCA6B)
    x = x ^ (x >> 13)
    x = x * jnp.uint32(0xC2B2AE35)
    x = x ^ (x >> 16)

    # P(drop) = threshold / 2^32 == p (to within 2^-32); kept edges unscaled.
    keep = x >= threshold
    a = adj_ref[...]
    out_ref[...] = jnp.where(keep, a, jnp.zeros((), dtype=a.dtype))


def _vmem_budget_bytes():
    """Generation-aware scoped-VMEM budget for this kernel."""
    phys = None
    try:
        info = pltpu.get_tpu_info()
        phys = int(getattr(info, "vmem_capacity_bytes", 0)) or None
    except Exception:
        phys = None
    if phys is None:
        # No TPU info available: assume the smallest generation (v7x, 64 MiB).
        phys = 64 * 1024 * 1024
    # ~3/4 of physical VMEM, capped at 96 MiB (v5e/v6e), floored at 32 MiB.
    return max(32 * 1024 * 1024, min(96 * 1024 * 1024, (phys * 3) // 4))


_COL_CANDIDATES = (8192, 4096, 2048, 1024, 512, 256, 128)
_ROW_CANDIDATES = (16384, 8192, 4096, 2048, 1024, 512, 256, 128, 64, 32, 16, 8)


def _choose_block(n_rows, n_cols, itemsize, target_bytes):
    """Pick a (row_tile, col_tile) block of roughly `target_bytes`.

    Tiles are lane-dense (full width whenever possible), multiples of (8, 128)
    or the full dim, and never degrade to a whole-array block for awkward N:
    if no clean divisor exists we use a multiple-of-8 row tile with a cdiv grid
    (Pallas masks the partial tail tile).
    """
    # Column tile: full width unless even an 8-row slab would blow the target.
    if n_cols * 8 * itemsize > target_bytes:
        col_tile = 128
        for cand in _COL_CANDIDATES:
            if cand <= n_cols and cand * 8 * itemsize <= target_bytes:
                col_tile = cand
                break
    else:
        col_tile = n_cols

    # Row tile.
    if n_rows * col_tile * itemsize <= target_bytes:
        row_tile = n_rows
    else:
        max_rows = max(8, target_bytes // (col_tile * itemsize))
        row_tile = None
        # Prefer an exact divisor (no masked tail stores).
        for cand in _ROW_CANDIDATES:
            if cand <= max_rows and n_rows % cand == 0:
                row_tile = cand
                break
        if row_tile is None:
            # No clean divisor (odd / prime N): multiple of 8 + cdiv grid.
            row_tile = min(n_rows, max(8, (max_rows // 8) * 8))
    return row_tile, col_tile


def drop_edge(adj, *, p, seed, training=True, block=None, donate=False):
    """DropEdge forward. adj: [N, N] float (dense adjacency)."""
    if (not training) or p <= 0.0:
        return adj
    if p >= 1.0:
        return jnp.zeros_like(adj)

    n_rows, n_cols = adj.shape
    itemsize = jnp.dtype(adj.dtype).itemsize

    vmem_limit = _vmem_budget_bytes()
    if block is None:
        # in + out, double-buffered = 4x tile bytes of VMEM -> target ~limit/8.
        target_bytes = max(2 * 1024 * 1024, min(16 * 1024 * 1024, vmem_limit // 8))
        row_tile, col_tile = _choose_block(n_rows, n_cols, itemsize, target_bytes)
    else:
        row_tile, col_tile = block

    # Drop threshold in [1, 2^32 - 1]; passed at runtime (no recompile per p).
    threshold = int(round(float(p) * (1 << 32)))
    threshold = max(1, min(threshold, (1 << 32) - 1))

    params = np.array([int(seed) & 0xFFFFFFFF, threshold], dtype=np.uint32)
    params = jnp.asarray(params.view(np.int32))  # SMEM scalars as int32 bits

    kernel = functools.partial(_dropedge_kernel, n_cols, row_tile, col_tile)
    grid = (pl.cdiv(n_rows, row_tile), pl.cdiv(n_cols, col_tile))

    return pl.pallas_call(
        kernel,
        out_shape=jax.ShapeDtypeStruct((n_rows, n_cols), adj.dtype),
        grid_spec=pltpu.PrefetchScalarGridSpec(
            num_scalar_prefetch=1,
            grid=grid,
            in_specs=[
                pl.BlockSpec((row_tile, col_tile), lambda i, j, _p: (i, j)),
            ],
            out_specs=pl.BlockSpec((row_tile, col_tile), lambda i, j, _p: (i, j)),
        ),
        compiler_params=pltpu.CompilerParams(
            # Tiles are fully independent: let v7x megacore shard them across
            # both TensorCores; neutral on v5e/v6e (single TC).
            dimension_semantics=("parallel", "parallel"),
            vmem_limit_bytes=vmem_limit,
        ),
        # Optionally overwrite adj in place (adj is operand 1; operand 0 is the
        # prefetched scalar params array).
        input_output_aliases=({1: 0} if donate else {}),
    )(params, adj)


if __name__ == "__main__":
    key = jax.random.PRNGKey(0)
    N = 256
    p = 0.5

    # Deterministic synthetic dense adjacency: ~20% edges, weight 1.0, no self-loops.
    k_adj, _ = jax.random.split(key)
    adj = (jax.random.uniform(k_adj, (N, N)) < 0.2).astype(jnp.float32)
    adj = adj * (1.0 - jnp.eye(N, dtype=jnp.float32))

    # Training mode: edges dropped with probability p.
    out_train = jax.block_until_ready(drop_edge(adj, p=p, seed=1234, training=True))

    # Eval mode: identity.
    out_eval = jax.block_until_ready(drop_edge(adj, p=p, seed=1234, training=False))

    # Same seed, explicit smaller tiling -> identical mask (hash depends only on
    # the global element index + seed, not on the block decomposition).
    out_tiled = jax.block_until_ready(
        drop_edge(adj, p=p, seed=1234, training=True, block=(64, 128)))

    # Sanity: kept entries equal the original, dropped entries are zero,
    # roughly (1-p) of the edges survive, mask is tiling-invariant, and a
    # different seed gives a different mask.
    is_kept = out_train == adj
    is_dropped = out_train == 0.0
    assert bool(jnp.all(is_kept | is_dropped))
    assert bool(jnp.all(out_eval == adj))
    assert bool(jnp.all(out_tiled == out_train))

    n_edges = float(jnp.sum(adj))
    n_kept = float(jnp.sum(out_train))
    keep_frac = n_kept / max(n_edges, 1.0)
    assert 0.35 < keep_frac < 0.65, f"unexpected keep fraction {keep_frac}"

    out_seed2 = jax.block_until_ready(drop_edge(adj, p=p, seed=1235, training=True))
    assert not bool(jnp.all(out_seed2 == out_train))

    print("KERNEL_OK")
</pallas_src>

<mosaic_0001>
module attributes {stable_mosaic.version = 11 : i64} {
  func.func @_dropedge_kernel(%arg0: i32, %arg1: i32, %arg2: memref<2xi32, #tpu.memory_space<smem>>, %arg3: memref<256x256xf32, #tpu.memory_space<vmem>>, %arg4: memref<256x256xf32, #tpu.memory_space<vmem>>) attributes {dimension_semantics = [#tpu.dimension_semantics<parallel>, #tpu.dimension_semantics<parallel>], iteration_bounds = array<i64: 1, 1>, scalar_prefetch = 1 : i64, scratch_operands = 0 : i64, tpu.core_type = #tpu.core_type<tc>, window_params = [{transform_indices = @transform_0, window_bounds = array<i64: 256, 256>}, {transform_indices = @transform_1, window_bounds = array<i64: 256, 256>}]} {
    %c0 = arith.constant 0 : index
    %0 = memref.load %arg2[%c0] : memref<2xi32, #tpu.memory_space<smem>>
    %c1 = arith.constant 1 : index
    %1 = memref.load %arg2[%c1] : memref<2xi32, #tpu.memory_space<smem>>
    %c256_i32 = arith.constant 256 : i32
    %2 = arith.muli %arg0, %c256_i32 : i32
    %c256_i32_0 = arith.constant 256 : i32
    %3 = arith.muli %arg1, %c256_i32_0 : i32
    %4 = tpu.iota {dimensions = array<i32: 0>} : vector<256x256xi32>
    %5 = vector.broadcast %2 : i32 to vector<256x256xi32>
    %6 = arith.addi %4, %5 : vector<256x256xi32>
    %7 = tpu.iota {dimensions = array<i32: 1>} : vector<256x256xi32>
    %8 = vector.broadcast %3 : i32 to vector<256x256xi32>
    %9 = arith.addi %7, %8 : vector<256x256xi32>
    %c256_i32_1 = arith.constant 256 : i32
    %10 = vector.broadcast %c256_i32_1 : i32 to vector<256x256xi32>
    %11 = arith.muli %6, %10 : vector<256x256xi32>
    %12 = arith.addi %11, %9 : vector<256x256xi32>
    %c-1640531527_i32 = arith.constant -1640531527 : i32
    %13 = arith.muli %0, %c-1640531527_i32 : i32
    %14 = vector.broadcast %13 : i32 to vector<256x256xi32>
    %15 = arith.xori %12, %14 : vector<256x256xi32>
    %c16_i32 = arith.constant 16 : i32
    %16 = vector.broadcast %c16_i32 : i32 to vector<256x256xi32>
    %17 = arith.shrui %15, %16 : vector<256x256xi32>
    %18 = arith.xori %15, %17 : vector<256x256xi32>
    %c-2048144789_i32 = arith.constant -2048144789 : i32
    %19 = vector.broadcast %c-2048144789_i32 : i32 to vector<256x256xi32>
    %20 = arith.muli %18, %19 : vector<256x256xi32>
    %c13_i32 = arith.constant 13 : i32
    %21 = vector.broadcast %c13_i32 : i32 to vector<256x256xi32>
    %22 = arith.shrui %20, %21 : vector<256x256xi32>
    %23 = arith.xori %20, %22 : vector<256x256xi32>
    %c-1028477387_i32 = arith.constant -1028477387 : i32
    %24 = vector.broadcast %c-1028477387_i32 : i32 to vector<256x256xi32>
    %25 = arith.muli %23, %24 : vector<256x256xi32>
    %c16_i32_2 = arith.constant 16 : i32
    %26 = vector.broadcast %c16_i32_2 : i32 to vector<256x256xi32>
    %27 = arith.shrui %25, %26 : vector<256x256xi32>
    %28 = arith.xori %25, %27 : vector<256x256xi32>
    %29 = vector.broadcast %1 : i32 to vector<256x256xi32>
    %30 = arith.cmpi uge, %28, %29 : vector<256x256xi32>
    %c0_3 = arith.constant 0 : index
    %c0_4 = arith.constant 0 : index
    %31 = vector.load %arg3[%c0_3, %c0_4] : memref<256x256xf32, #tpu.memory_space<vmem>>, vector<256x256xf32>
    %cst = arith.constant 0.000000e+00 : f32
    %32 = vector.broadcast %cst : f32 to vector<256x256xf32>
    %33 = arith.select %30, %31, %32 : vector<256x256xi1>, vector<256x256xf32>
    %c0_5 = arith.constant 0 : index
    %c0_6 = arith.constant 0 : index
    %34 = vector.load %arg4[%c0_5, %c0_6] : memref<256x256xf32, #tpu.memory_space<vmem>>, vector<256x256xf32>
    tpu.vector_store %arg4[%c0_5, %c0_6], %33 {strides = array<i32>} : memref<256x256xf32, #tpu.memory_space<vmem>>, vector<256x256xf32>,
    return
  }
  func.func @transform_0(%arg0: i32, %arg1: i32, %arg2: memref<2xi32, #tpu.memory_space<smem>>) -> (i32, i32) {
    %c0_i32 = arith.constant 0 : i32
    return %arg0, %arg1 : i32, i32
  }
  func.func @transform_1(%arg0: i32, %arg1: i32, %arg2: memref<2xi32, #tpu.memory_space<smem>>) -> (i32, i32) {
    %c0_i32 = arith.constant 0 : i32
    return %arg0, %arg1 : i32, i32
  }
}

</mosaic_0001>

<bundles_post_ra>
// kernel: tpu_custom_call.1
= control target key start
LH: loop header
LB: loop body
LE: loop exit
PB: predicated region body
PF: predicated region fallthrough
CT: control target
= control target key end

     0   :  { %s1463_s0 = inlined_call_operand.hbm [shape: s32[2], index: 0, kind: input, shape index: {}]   ;;  %s1464_s1 = inlined_call_operand.hbm [shape: f32[256,256], index: 1, kind: input, shape index: {}]   ;;  %s1465_s2 = inlined_call_operand.hbm [shape: f32[256,256], index: 2, kind: output, shape index: {}]  }
   0x1   :  { %s1058_s11 = scalar_lea.hbm %s1463_s0, 16 }
   0x2   :  { %p1059_p0 = scmp.ne.s32.totalorder %s1463_s0, %s1058_s11  ;;  %p1062_p1 = scmp.lt.u32.totalorder %s1058_s11, %s1463_s0 }
   0x4   :  { %p1064_p2 = pnand %p1062_p1, %p1059_p0 }
   0x6   :  { %1067 = shalt.err (!%p1064_p2)  }
   0x7   :  { %s1118_s16 = smov [#allocation3]  }
   0x8   :  { %8 = dma.hbm_to_smem %s1463_s0, 16, %s1118_s16, [#allocation2] }
   0x9   :  { %1112 = dma.done.wait [#allocation2], 16 }
   0xa   :  { %1113 = vsyncadd [#allocation2], 4294967280 }
   0xb   :  { %10 = sfence }
   0xc   :  { %11 = vsyncpa [#allocation5], 0 }
   0xd   :  { %12 = vsyncpa [#allocation6], 0  ;;  %s1119_s19 = smov [#allocation4]   ;;  %s1068_s23 = scalar_lea.hbm %s1464_s1, 8192 }
   0xe   :  { %s18_s20 = sshll.u32 %s1119_s19, 4  ;;  %p1069_p3 = scmp.ne.s32.totalorder %s1464_s1, %s1068_s23  ;;  %s19_s20 = int_to_ptr.vmem [resolvable:$true] %s18_s20 }
   0xf   :  { %p1072_p4 = scmp.lt.u32.totalorder %s1068_s23, %s1464_s1 }
  0x11   :  { %p1074_p5 = pnand %p1072_p4, %p1069_p3 }
  0x13   :  { %1077 = shalt.err (!%p1074_p5)
}
  0x14   :  { %s1078_s0 = scalar_lea.vmem %s19_s20, 8192  ;;  %p1083_p7 = scmp.lt.s32.totalorder %s19_s20, %s19_s20 }
  0x15   :  { %p1079_p6 = scmp.ne.s32.totalorder %s19_s20, %s1078_s0  ;;  %p1084_p8 = scmp.lt.s32.totalorder %s1078_s0, %s1078_s0 }
  0x17   :  { %p1085_p9 = por %p1084_p8, %p1083_p7 }
  0x19   :  { %p1086_p10 = pnand %p1085_p9, %p1079_p6 }
  0x1b   :  { %1089 = shalt.err (!%p1086_p10)
}
  0x1c   :  { %s1120_s28 = smov 256   ;;  %s1121_s29 = smov 16  }
  0x1d   :  { %24 = dma.hbm_to_vmem [thread:$0]  %s1464_s1, 8192, %s19_s20, [#allocation5], %s1120_s28, %s1120_s28, %s1121_s29  }
  0x1e   :  { %1114 = dma.done.wait [#allocation5], 8192  }
  0x1f   :  { %1115 = vsyncadd [#allocation5], 4294959104  ;;  %v32_v0 = vlaneseq  ;;  %s28_s4 = sld [smem:[#allocation3]]  ;;  %s1052_s5 = sld [smem:[#allocation3 + $0x1]] }
  0x20   :  { %s1122_s6 = smov [#allocation7]  }
  0x21   :  { %v1165_v1 = vshrl.u32 %v32_v0, 7  ;;  %v1167_v2 = vand.u32 127, %v32_v0  ;;  %s1040_s7 = sshll.u32 %s1122_s6, 4  ;;  %s1041_s7 = int_to_ptr.vmem [resolvable:$true] %s1040_s7 }
  0x22   :  { %s1090_s8 = scalar_lea.vmem %s1041_s7, 8192  ;;  %p1095_p12 = scmp.lt.s32.totalorder %s1041_s7, %s1041_s7 }
  0x23   :  { %v104_v3 = vmul.u32 256, %v1165_v1  ;;  %v1171_v4 = vadd.s32 128, %v1167_v2  ;;  %v34_v5 = vadd.s32 8, %v1165_v1  ;;  %v35_v6 = vadd.s32 16, %v1165_v1  ;;  %p1091_p11 = scmp.ne.s32.totalorder %s1041_s7, %s1090_s8  ;;  %p1096_p13 = scmp.lt.s32.totalorder %s1090_s8, %s1090_s8 }
  0x24   :  { %v36_v7 = vadd.s32 24, %v1165_v1  ;;  %v37_v8 = vadd.s32 32, %v1165_v1  ;;  %v1182_v15 = vadd.s32 40, %v1165_v1  ;;  %v1185_v16 = vadd.s32 48, %v1165_v1 }
  0x25   :  { %v136_v9 = vadd.s32 %v104_v3, %v1167_v2  ;;  %v137_v10 = vadd.s32 %v104_v3, %v1171_v4  ;;  %v105_v11 = vmul.u32 256, %v34_v5  ;;  %v106_v12 = vmul.u32 256, %v35_v6  ;;  %s200_s1 = smul.u32 2654435769, %s28_s4  ;;  %p1097_p0 = por %p1096_p13, %p1095_p12 }
  0x26   :  { %v1179_v13 = vstv %s1052_s5  ;;  %v107_v14 = vmul.u32 256, %v36_v7  ;;  %v108_v24 = vmul.u32 256, %v37_v8  ;;  %v1210_v55 = vadd.s32 56, %v1165_v1 }
  0x27   :  { %v138_v17 = vadd.s32 %v105_v11, %v1167_v2  ;;  %v139_v18 = vadd.s32 %v105_v11, %v1171_v4  ;;  %v140_v19 = vadd.s32 %v106_v12, %v1167_v2  ;;  %v141_v20 = vadd.s32 %v106_v12, %v1171_v4  ;;  %p1098_p1 = pnand %p1097_p0, %p1091_p11 }
  0x28   :  { %v1191_v21 = vstv %s200_s1  ;;  %v142_v22 = vadd.s32 %v107_v14, %v1167_v2  ;;  %v143_v23 = vadd.s32 %v107_v14, %v1171_v4  ;;  %v1204_v51 = vadd.s32 %v108_v24, %v1167_v2 }
  0x29   :  { %v202_v25 = vxor.u32 %v1191_v21, %v136_v9  ;;  %v203_v26 = vxor.u32 %v1191_v21, %v137_v10  ;;  %v204_v27 = vxor.u32 %v1191_v21, %v138_v17  ;;  %v205_v28 = vxor.u32 %v1191_v21, %v139_v18 }
  0x2a   :  { %v206_v29 = vxor.u32 %v1191_v21, %v140_v19  ;;  %v207_v30 = vxor.u32 %v1191_v21, %v141_v20  ;;  %v208_v31 = vxor.u32 %v1191_v21, %v142_v22  ;;  %v209_v32 = vxor.u32 %v1191_v21, %v143_v23 }
  0x2b   :  { %v266_v33 = vshrl.u32 %v202_v25, 16  ;;  %v267_v34 = vshrl.u32 %v203_v26, 16  ;;  %v268_v35 = vshrl.u32 %v204_v27, 16  ;;  %v269_v36 = vshrl.u32 %v205_v28, 16 }
  0x2c   :  { %v270_v37 = vshrl.u32 %v206_v29, 16  ;;  %v271_v38 = vshrl.u32 %v207_v30, 16  ;;  %v272_v39 = vshrl.u32 %v208_v31, 16  ;;  %v273_v40 = vshrl.u32 %v209_v32, 16 }
  0x2d   :  { %v330_v41 = vxor.u32 %v266_v33, %v202_v25  ;;  %v331_v42 = vxor.u32 %v267_v34, %v203_v26  ;;  %v332_v43 = vxor.u32 %v268_v35, %v204_v27  ;;  %v333_v44 = vxor.u32 %v269_v36, %v205_v28  ;;  %v843_v33 = vld [vmem:[#allocation4] sm:$0xff]  ;;  %v844_v35 = vld [vmem:[#allocation4 + $0x8] sm:$0xff] }
  0x2e   :  { %v334_v45 = vxor.u32 %v270_v37, %v206_v29  ;;  %v335_v46 = vxor.u32 %v271_v38, %v207_v30  ;;  %v336_v47 = vxor.u32 %v272_v39, %v208_v31  ;;  %v337_v48 = vxor.u32 %v273_v40, %v209_v32  ;;  %v845_v39 = vld [vmem:[#allocation4 + $0x10] sm:$0xff] }
  0x2f   :  { %v394_v49 = vmul.u32 2246822507, %v330_v41  ;;  %v395_v50 = vmul.u32 2246822507, %v331_v42  ;;  %v1207_v52 = vadd.s32 %v108_v24, %v1171_v4  ;;  %v1213_v56 = vadd.s32 64, %v1165_v1  ;;  %v846_v41 = vld [vmem:[#allocation4 + $0x18] sm:$0xff] }
  0x30   :  { %v396_v53 = vmul.u32 2246822507, %v332_v43  ;;  %v397_v54 = vmul.u32 2246822507, %v333_v44 }
  0x31   :  { %v458_v57 = vshrl.u32 %v394_v49, 13  ;;  %v459_v58 = vshrl.u32 %v395_v50, 13  ;;  %v398_v59 = vmul.u32 2246822507, %v334_v45  ;;  %v399_v60 = vmul.u32 2246822507, %v335_v46 }
  0x32   :  { %v460_v61 = vshrl.u32 %v396_v53, 13  ;;  %v461_v62 = vshrl.u32 %v397_v54, 13  ;;  %v400_v63 = vmul.u32 2246822507, %v336_v47  ;;  %v401_v0 = vmul.u32 2246822507, %v337_v48 }
  0x33   :  { %v522_v3 = vxor.u32 %v458_v57, %v394_v49  ;;  %v523_v5 = vxor.u32 %v459_v58, %v395_v50  ;;  %v462_v6 = vshrl.u32 %v398_v59, 13  ;;  %v463_v7 = vshrl.u32 %v399_v60, 13  ;;  %v847_v45 = vld [vmem:[#allocation4 + $0x20] sm:$0xff]  ;;  %v848_v47 = vld [vmem:[#allocation4 + $0x28] sm:$0xff] }
  0x34   :  { %v524_v8 = vxor.u32 %v460_v61, %v396_v53  ;;  %v525_v9 = vxor.u32 %v461_v62, %v397_v54  ;;  %v464_v10 = vshrl.u32 %v400_v63, 13  ;;  %v465_v11 = vshrl.u32 %v401_v0, 13  ;;  %v850_v61 = vld [vmem:[#allocation4 + $0x38] sm:$0xff] }
  0x35   :  { %v586_v12 = vmul.u32 3266489909, %v522_v3  ;;  %v587_v14 = vmul.u32 3266489909, %v523_v5  ;;  %v526_v17 = vxor.u32 %v462_v6, %v398_v59  ;;  %v527_v18 = vxor.u32 %v463_v7, %v399_v60  ;;  %v849_v59 = vld [vmem:[#allocation4 + $0x30] sm:$0xff] }
  0x36   :  { %v588_v19 = vmul.u32 3266489909, %v524_v8  ;;  %v589_v20 = vmul.u32 3266489909, %v525_v9  ;;  %v528_v22 = vxor.u32 %v464_v10, %v400_v63  ;;  %v529_v23 = vxor.u32 %v465_v11, %v401_v0 }
  0x37   :  { %v650_v24 = vshrl.u32 %v586_v12, 16  ;;  %v651_v25 = vshrl.u32 %v587_v14, 16  ;;  %v590_v26 = vmul.u32 3266489909, %v526_v17  ;;  %v591_v27 = vmul.u32 3266489909, %v527_v18 }
  0x38   :  { %v652_v28 = vshrl.u32 %v588_v19, 16  ;;  %v653_v29 = vshrl.u32 %v589_v20, 16  ;;  %v592_v30 = vmul.u32 3266489909, %v528_v22  ;;  %v593_v31 = vmul.u32 3266489909, %v529_v23 }
  0x39   :  { %v714_v32 = vxor.u32 %v650_v24, %v586_v12  ;;  %v715_v34 = vxor.u32 %v651_v25, %v587_v14  ;;  %v654_v36 = vshrl.u32 %v590_v26, 16  ;;  %v655_v37 = vshrl.u32 %v591_v27, 16 }
  0x3a   :  { %v716_v38 = vxor.u32 %v652_v28, %v588_v19  ;;  %v717_v40 = vxor.u32 %v653_v29, %v589_v20  ;;  %v656_v42 = vshrl.u32 %v592_v30, 16  ;;  %v657_v43 = vshrl.u32 %v593_v31, 16 }
  0x3b   :  { %vm779_vm0 = vcmp.ge.u32.totalorder %v714_v32, %v1179_v13  ;;  %vm780_vm1 = vcmp.ge.u32.totalorder %v715_v34, %v1179_v13  ;;  %v718_v44 = vxor.u32 %v654_v36, %v590_v26  ;;  %v719_v46 = vxor.u32 %v655_v37, %v591_v27 }
  0x3c   :  { %v907_v48 = vsel %vm779_vm0, %v843_v33, 0.0  ;;  %v908_v49 = vsel %vm780_vm1, %v844_v35, 0.0  ;;  %vm781_vm2 = vcmp.ge.u32.totalorder %v716_v38, %v1179_v13  ;;  %vm782_vm3 = vcmp.ge.u32.totalorder %v717_v40, %v1179_v13 }
  0x3d   :  { %971 = vst [vmem:[#allocation7] sm:$0xff] %v907_v48  ;;  %972 = vst [vmem:[#allocation7 + $0x8] sm:$0xff] %v908_v49  ;;  %v909_v50 = vsel %vm781_vm2, %v845_v39, 0.0  ;;  %v910_v53 = vsel %vm782_vm3, %v846_v41, 0.0  ;;  %vm783_vm4 = vcmp.ge.u32.totalorder %v718_v44, %v1179_v13  ;;  %vm784_vm5 = vcmp.ge.u32.totalorder %v719_v46, %v1179_v13 }
  0x3e   :  { %973 = vst [vmem:[#allocation7 + $0x10] sm:$0xff] %v909_v50  ;;  %974 = vst [vmem:[#allocation7 + $0x18] sm:$0xff] %v910_v53  ;;  %v911_v54 = vsel %vm783_vm4, %v847_v45, 0.0  ;;  %v912_v57 = vsel %vm784_vm5, %v848_v47, 0.0  ;;  %v720_v58 = vxor.u32 %v656_v42, %v592_v30  ;;  %v721_v60 = vxor.u32 %v657_v43, %v593_v31 }
  0x3f   :  { %975 = vst [vmem:[#allocation7 + $0x20] sm:$0xff] %v911_v54  ;;  %976 = vst [vmem:[#allocation7 + $0x28] sm:$0xff] %v912_v57  ;;  %v210_v62 = vxor.u32 %v1191_v21, %v1204_v51  ;;  %v211_v63 = vxor.u32 %v1191_v21, %v1207_v52  ;;  %v109_v0 = vmul.u32 256, %v1182_v15  ;;  %v110_v3 = vmul.u32 256, %v1185_v16 }
  0x40   :  { %vm785_vm6 = vcmp.ge.u32.totalorder %v720_v58, %v1179_v13  ;;  %vm786_vm7 = vcmp.ge.u32.totalorder %v721_v60, %v1179_v13  ;;  %v111_v5 = vmul.u32 256, %v1210_v55  ;;  %v112_v6 = vmul.u32 256, %v1213_v56 }
  0x41   :  { %v913_v7 = vsel %vm785_vm6, %v849_v59, 0.0  ;;  %v914_v8 = vsel %vm786_vm7, %v850_v61, 0.0  ;;  %v274_v9 = vshrl.u32 %v210_v62, 16  ;;  %v275_v10 = vshrl.u32 %v211_v63, 16 }
  0x42   :  { %977 = vst [vmem:[#allocation7 + $0x30] sm:$0xff] %v913_v7  ;;  %978 = vst [vmem:[#allocation7 + $0x38] sm:$0xff] %v914_v8  ;;  %v146_v51 = vadd.s32 %v109_v0, %v1167_v2  ;;  %v147_v15 = vadd.s32 %v109_v0, %v1171_v4  ;;  %v148_v16 = vadd.s32 %v110_v3, %v1167_v2  ;;  %v1246_v47 = vadd.s32 72, %v1165_v1  ;;  %v852_v7 = vld [vmem:[#allocation4 + $0x48] sm:$0xff] }
  0x43   :  { %v149_v52 = vadd.s32 %v110_v3, %v1171_v4  ;;  %v338_v11 = vxor.u32 %v274_v9, %v210_v62  ;;  %v339_v12 = vxor.u32 %v275_v10, %v211_v63  ;;  %v150_v55 = vadd.s32 %v111_v5, %v1167_v2 }
  0x44   :  { %v151_v56 = vadd.s32 %v111_v5, %v1171_v4  ;;  %v212_v14 = vxor.u32 %v1191_v21, %v146_v51  ;;  %v213_v17 = vxor.u32 %v1191_v21, %v147_v15  ;;  %v214_v18 = vxor.u32 %v1191_v21, %v148_v16  ;;  %v851_v5 = vld [vmem:[#allocation4 + $0x40] sm:$0xff] }
  0x45   :  { %v215_v19 = vxor.u32 %v1191_v21, %v149_v52  ;;  %v402_v20 = vmul.u32 2246822507, %v338_v11  ;;  %v403_v22 = vmul.u32 2246822507, %v339_v12  ;;  %v216_v23 = vxor.u32 %v1191_v21, %v150_v55 }
  0x46   :  { %v217_v24 = vxor.u32 %v1191_v21, %v151_v56  ;;  %v276_v25 = vshrl.u32 %v212_v14, 16  ;;  %v277_v26 = vshrl.u32 %v213_v17, 16  ;;  %v278_v27 = vshrl.u32 %v214_v18, 16 }
  0x47   :  { %v279_v28 = vshrl.u32 %v215_v19, 16  ;;  %v466_v29 = vshrl.u32 %v402_v20, 13  ;;  %v467_v30 = vshrl.u32 %v403_v22, 13  ;;  %v280_v31 = vshrl.u32 %v216_v23, 16 }
  0x48   :  { %v281_v32 = vshrl.u32 %v217_v24, 16  ;;  %v340_v33 = vxor.u32 %v276_v25, %v212_v14  ;;  %v341_v34 = vxor.u32 %v277_v26, %v213_v17  ;;  %v342_v35 = vxor.u32 %v278_v27, %v214_v18  ;;  %v854_v25 = vld [vmem:[#allocation4 + $0x58] sm:$0xff] }
  0x49   :  { %v343_v36 = vxor.u32 %v279_v28, %v215_v19  ;;  %v530_v37 = vxor.u32 %v466_v29, %v402_v20  ;;  %v531_v38 = vxor.u32 %v467_v30, %v403_v22  ;;  %v344_v39 = vxor.u32 %v280_v31, %v216_v23  ;;  %v853_v23 = vld [vmem:[#allocation4 + $0x50] sm:$0xff] }
  0x4a   :  { %v345_v40 = vxor.u32 %v281_v32, %v217_v24  ;;  %v404_v41 = vmul.u32 2246822507, %v340_v33  ;;  %v405_v42 = vmul.u32 2246822507, %v341_v34  ;;  %v152_v43 = vadd.s32 %v112_v6, %v1167_v2 }
  0x4b   :  { %v153_v44 = vadd.s32 %v112_v6, %v1171_v4  ;;  %v594_v45 = vmul.u32 3266489909, %v530_v37  ;;  %v595_v46 = vmul.u32 3266489909, %v531_v38  ;;  %v1249_v48 = vadd.s32 80, %v1165_v1  ;;  %v855_v37 = vld [vmem:[#allocation4 + $0x60] sm:$0xff] }
  0x4c   :  { %v468_v49 = vshrl.u32 %v404_v41, 13  ;;  %v469_v50 = vshrl.u32 %v405_v42, 13  ;;  %v406_v53 = vmul.u32 2246822507, %v342_v35  ;;  %v407_v54 = vmul.u32 2246822507, %v343_v36 }
  0x4d   :  { %v658_v57 = vshrl.u32 %v594_v45, 16  ;;  %v659_v58 = vshrl.u32 %v595_v46, 16  ;;  %v408_v59 = vmul.u32 2246822507, %v344_v39  ;;  %v409_v60 = vmul.u32 2246822507, %v345_v40 }
  0x4e   :  { %v532_v61 = vxor.u32 %v468_v49, %v404_v41  ;;  %v533_v62 = vxor.u32 %v469_v50, %v405_v42  ;;  %v470_v63 = vshrl.u32 %v406_v53, 13  ;;  %v471_v0 = vshrl.u32 %v407_v54, 13  ;;  %v856_v39 = vld [vmem:[#allocation4 + $0x68] sm:$0xff]  ;;  %v857_v41 = vld [vmem:[#allocation4 + $0x70] sm:$0xff] }
  0x4f   :  { %v722_v3 = vxor.u32 %v658_v57, %v594_v45  ;;  %v723_v6 = vxor.u32 %v659_v58, %v595_v46  ;;  %v472_v8 = vshrl.u32 %v408_v59, 13  ;;  %v473_v9 = vshrl.u32 %v409_v60, 13 }
  0x50   :  { %v596_v10 = vmul.u32 3266489909, %v532_v61  ;;  %v597_v51 = vmul.u32 3266489909, %v533_v62  ;;  %v534_v15 = vxor.u32 %v470_v63, %v406_v53  ;;  %v535_v16 = vxor.u32 %v471_v0, %v407_v54 }
  0x51   :  { %vm787_vm8 = vcmp.ge.u32.totalorder %v722_v3, %v1179_v13  ;;  %vm788_vm9 = vcmp.ge.u32.totalorder %v723_v6, %v1179_v13  ;;  %v536_v52 = vxor.u32 %v472_v8, %v408_v59  ;;  %v537_v11 = vxor.u32 %v473_v9, %v409_v60 }
  0x52   :  { %v915_v12 = vsel %vm787_vm8, %v851_v5, 0.0  ;;  %v916_v55 = vsel %vm788_vm9, %v852_v7, 0.0  ;;  %v660_v56 = vshrl.u32 %v596_v10, 16  ;;  %v661_v14 = vshrl.u32 %v597_v51, 16 }
  0x53   :  { %979 = vst [vmem:[#allocation7 + $0x40] sm:$0xff] %v915_v12  ;;  %980 = vst [vmem:[#allocation7 + $0x48] sm:$0xff] %v916_v55  ;;  %v598_v17 = vmul.u32 3266489909, %v534_v15  ;;  %v599_v18 = vmul.u32 3266489909, %v535_v16  ;;  %v218_v19 = vxor.u32 %v1191_v21, %v152_v43  ;;  %v219_v20 = vxor.u32 %v1191_v21, %v153_v44 }
  0x54   :  { %v724_v22 = vxor.u32 %v660_v56, %v596_v10  ;;  %v725_v24 = vxor.u32 %v661_v14, %v597_v51  ;;  %v600_v26 = vmul.u32 3266489909, %v536_v52  ;;  %v601_v27 = vmul.u32 3266489909, %v537_v11  ;;  %v858_v43 = vld [vmem:[#allocation4 + $0x78] sm:$0xff] }
  0x55   :  { %v662_v28 = vshrl.u32 %v598_v17, 16  ;;  %v663_v29 = vshrl.u32 %v599_v18, 16  ;;  %v282_v30 = vshrl.u32 %v218_v19, 16  ;;  %v283_v31 = vshrl.u32 %v219_v20, 16 }
  0x56   :  { %vm789_vm10 = vcmp.ge.u32.totalorder %v724_v22, %v1179_v13  ;;  %vm790_vm11 = vcmp.ge.u32.totalorder %v725_v24, %v1179_v13  ;;  %v664_v32 = vshrl.u32 %v600_v26, 16  ;;  %v665_v33 = vshrl.u32 %v601_v27, 16 }
  0x57   :  { %v917_v34 = vsel %vm789_vm10, %v853_v23, 0.0  ;;  %v918_v35 = vsel %vm790_vm11, %v854_v25, 0.0  ;;  %v726_v36 = vxor.u32 %v662_v28, %v598_v17  ;;  %v727_v38 = vxor.u32 %v663_v29, %v599_v18 }
  0x58   :  { %981 = vst [vmem:[#allocation7 + $0x50] sm:$0xff] %v917_v34  ;;  %982 = vst [vmem:[#allocation7 + $0x58] sm:$0xff] %v918_v35  ;;  %v728_v40 = vxor.u32 %v664_v32, %v600_v26  ;;  %v729_v42 = vxor.u32 %v665_v33, %v601_v27  ;;  %v346_v44 = vxor.u32 %v282_v30, %v218_v19  ;;  %v113_v46 = vmul.u32 256, %v1246_v47  ;;  %v859_v32 = vld [vmem:[#allocation4 + $0x80] sm:$0xff]  ;;  %v860_v34 = vld [vmem:[#allocation4 + $0x88] sm:$0xff] }
  0x59   :  { %v347_v45 = vxor.u32 %v283_v31, %v219_v20  ;;  %vm791_vm12 = vcmp.ge.u32.totalorder %v726_v36, %v1179_v13  ;;  %vm792_vm13 = vcmp.ge.u32.totalorder %v727_v38, %v1179_v13  ;;  %v114_v49 = vmul.u32 256, %v1249_v48 }
  0x5a   :  { %v919_v50 = vsel %vm791_vm12, %v855_v37, 0.0  ;;  %v920_v53 = vsel %vm792_vm13, %v856_v39, 0.0  ;;  %vm793_vm14 = vcmp.ge.u32.totalorder %v728_v40, %v1179_v13  ;;  %vm794_vm15 = vcmp.ge.u32.totalorder %v729_v42, %v1179_v13 }
  0x5b   :  { %983 = vst [vmem:[#allocation7 + $0x60] sm:$0xff] %v919_v50  ;;  %984 = vst [vmem:[#allocation7 + $0x68] sm:$0xff] %v920_v53  ;;  %v921_v54 = vsel %vm793_vm14, %v857_v41, 0.0  ;;  %v922_v57 = vsel %vm794_vm15, %v858_v43, 0.0  ;;  %v410_v58 = vmul.u32 2246822507, %v346_v44  ;;  %v154_v60 = vadd.s32 %v113_v46, %v1167_v2 }
  0x5c   :  { %v411_v59 = vmul.u32 2246822507, %v347_v45  ;;  %985 = vst [vmem:[#allocation7 + $0x70] sm:$0xff] %v921_v54  ;;  %986 = vst [vmem:[#allocation7 + $0x78] sm:$0xff] %v922_v57  ;;  %v155_v47 = vadd.s32 %v113_v46, %v1171_v4  ;;  %v156_v48 = vadd.s32 %v114_v49, %v1167_v2  ;;  %v157_v61 = vadd.s32 %v114_v49, %v1171_v4 }
  0x5d   :  { %v474_v62 = vshrl.u32 %v410_v58, 13  ;;  %v44_v0 = vadd.s32 88, %v1165_v1  ;;  %v45_v3 = vadd.s32 96, %v1165_v1  ;;  %v220_v5 = vxor.u32 %v1191_v21, %v154_v60 }
  0x5e   :  { %v475_v63 = vshrl.u32 %v411_v59, 13  ;;  %v221_v6 = vxor.u32 %v1191_v21, %v155_v47  ;;  %v222_v7 = vxor.u32 %v1191_v21, %v156_v48  ;;  %v223_v8 = vxor.u32 %v1191_v21, %v157_v61 }
  0x5f   :  { %v538_v9 = vxor.u32 %v474_v62, %v410_v58  ;;  %v115_v51 = vmul.u32 256, %v44_v0  ;;  %v116_v15 = vmul.u32 256, %v45_v3  ;;  %v284_v16 = vshrl.u32 %v220_v5, 16 }
  0x60   :  { %v539_v10 = vxor.u32 %v475_v63, %v411_v59  ;;  %v285_v52 = vshrl.u32 %v221_v6, 16  ;;  %v286_v11 = vshrl.u32 %v222_v7, 16  ;;  %v287_v12 = vshrl.u32 %v223_v8, 16 }
  0x61   :  { %v602_v55 = vmul.u32 3266489909, %v538_v9  ;;  %v158_v14 = vadd.s32 %v115_v51, %v1167_v2  ;;  %v159_v17 = vadd.s32 %v115_v51, %v1171_v4  ;;  %v348_v18 = vxor.u32 %v284_v16, %v220_v5  ;;  %v861_v51 = vld [vmem:[#allocation4 + $0x90] sm:$0xff]  ;;  %v862_v16 = vld [vmem:[#allocation4 + $0x98] sm:$0xff] }
  0x62   :  { %v603_v56 = vmul.u32 3266489909, %v539_v10  ;;  %v349_v19 = vxor.u32 %v285_v52, %v221_v6  ;;  %v350_v20 = vxor.u32 %v286_v11, %v222_v7  ;;  %v351_v22 = vxor.u32 %v287_v12, %v223_v8 }
  0x63   :  { %v666_v23 = vshrl.u32 %v602_v55, 16  ;;  %v224_v25 = vxor.u32 %v1191_v21, %v158_v14  ;;  %v225_v26 = vxor.u32 %v1191_v21, %v159_v17  ;;  %v412_v27 = vmul.u32 2246822507, %v348_v18  ;;  %v864_v14 = vld [vmem:[#allocation4 + $0xa8] sm:$0xff] }
  0x64   :  { %v667_v24 = vshrl.u32 %v603_v56, 16  ;;  %v413_v28 = vmul.u32 2246822507, %v349_v19  ;;  %v160_v29 = vadd.s32 %v116_v15, %v1167_v2  ;;  %v161_v30 = vadd.s32 %v116_v15, %v1171_v4 }
  0x65   :  { %v730_v31 = vxor.u32 %v666_v23, %v602_v55  ;;  %v414_v35 = vmul.u32 2246822507, %v350_v20  ;;  %v415_v36 = vmul.u32 2246822507, %v351_v22  ;;  %v476_v37 = vshrl.u32 %v412_v27, 13  ;;  %v863_v55 = vld [vmem:[#allocation4 + $0xa0] sm:$0xff] }
  0x66   :  { %v731_v33 = vxor.u32 %v667_v24, %v603_v56  ;;  %v477_v38 = vshrl.u32 %v413_v28, 13  ;;  %v288_v39 = vshrl.u32 %v224_v25, 16  ;;  %v289_v40 = vshrl.u32 %v225_v26, 16 }
  0x67   :  { %vm795_vm0 = vcmp.ge.u32.totalorder %v730_v31, %v1179_v13  ;;  %v478_v41 = vshrl.u32 %v414_v35, 13  ;;  %v479_v42 = vshrl.u32 %v415_v36, 13  ;;  %v540_v45 = vxor.u32 %v476_v37, %v412_v27 }
  0x68   :  { %vm796_vm1 = vcmp.ge.u32.totalorder %v731_v33, %v1179_v13  ;;  %v923_v43 = vsel %vm795_vm0, %v859_v32, 0.0  ;;  %v541_v46 = vxor.u32 %v477_v38, %v413_v28  ;;  %v352_v53 = vxor.u32 %v288_v39, %v224_v25 }
  0x69   :  { %v924_v44 = vsel %vm796_vm1, %v860_v34, 0.0  ;;  %987 = vst [vmem:[#allocation7 + $0x80] sm:$0xff] %v923_v43  ;;  %v542_v49 = vxor.u32 %v478_v41, %v414_v35  ;;  %v543_v50 = vxor.u32 %v479_v42, %v415_v36  ;;  %v353_v54 = vxor.u32 %v289_v40, %v225_v26  ;;  %v865_v41 = vld [vmem:[#allocation4 + $0xb0] sm:$0xff]  ;;  %v866_v43 = vld [vmem:[#allocation4 + $0xb8] sm:$0xff] }
  0x6a   :  { %988 = vst [vmem:[#allocation7 + $0x88] sm:$0xff] %v924_v44  ;;  %v604_v57 = vmul.u32 3266489909, %v540_v45  ;;  %v605_v58 = vmul.u32 3266489909, %v541_v46  ;;  %v226_v59 = vxor.u32 %v1191_v21, %v160_v29  ;;  %v227_v60 = vxor.u32 %v1191_v21, %v161_v30 }
  0x6b   :  { %v606_v47 = vmul.u32 3266489909, %v542_v49  ;;  %v607_v48 = vmul.u32 3266489909, %v543_v50  ;;  %v46_v61 = vadd.s32 104, %v1165_v1  ;;  %v47_v62 = vadd.s32 112, %v1165_v1 }
  0x6c   :  { %v668_v63 = vshrl.u32 %v604_v57, 16  ;;  %v669_v0 = vshrl.u32 %v605_v58, 16  ;;  %v416_v3 = vmul.u32 2246822507, %v352_v53  ;;  %v417_v5 = vmul.u32 2246822507, %v353_v54 }
  0x6d   :  { %v670_v6 = vshrl.u32 %v606_v47, 16  ;;  %v671_v7 = vshrl.u32 %v607_v48, 16  ;;  %v290_v8 = vshrl.u32 %v226_v59, 16  ;;  %v291_v9 = vshrl.u32 %v227_v60, 16 }
  0x6e   :  { %v732_v10 = vxor.u32 %v668_v63, %v604_v57  ;;  %v733_v15 = vxor.u32 %v669_v0, %v605_v58  ;;  %v480_v52 = vshrl.u32 %v416_v3, 13  ;;  %v481_v11 = vshrl.u32 %v417_v5, 13 }
  0x6f   :  { %v734_v12 = vxor.u32 %v670_v6, %v606_v47  ;;  %v735_v56 = vxor.u32 %v671_v7, %v607_v48  ;;  %v354_v17 = vxor.u32 %v290_v8, %v226_v59  ;;  %v355_v18 = vxor.u32 %v291_v9, %v227_v60 }
  0x70   :  { %vm797_vm2 = vcmp.ge.u32.totalorder %v732_v10, %v1179_v13  ;;  %vm798_vm3 = vcmp.ge.u32.totalorder %v733_v15, %v1179_v13  ;;  %v544_v19 = vxor.u32 %v480_v52, %v416_v3  ;;  %v545_v20 = vxor.u32 %v481_v11, %v417_v5  ;;  %v867_v15 = vld [vmem:[#allocation4 + $0xc0] sm:$0xff]  ;;  %v868_v52 = vld [vmem:[#allocation4 + $0xc8] sm:$0xff] }
  0x71   :  { %v925_v22 = vsel %vm797_vm2, %v861_v51, 0.0  ;;  %v926_v23 = vsel %vm798_vm3, %v862_v16, 0.0  ;;  %vm799_vm4 = vcmp.ge.u32.totalorder %v734_v12, %v1179_v13  ;;  %vm800_vm5 = vcmp.ge.u32.totalorder %v735_v56, %v1179_v13 }
  0x72   :  { %989 = vst [vmem:[#allocation7 + $0x90] sm:$0xff] %v925_v22  ;;  %990 = vst [vmem:[#allocation7 + $0x98] sm:$0xff] %v926_v23  ;;  %v927_v24 = vsel %vm799_vm4, %v863_v55, 0.0  ;;  %v928_v25 = vsel %vm800_vm5, %v864_v14, 0.0  ;;  %v608_v26 = vmul.u32 3266489909, %v544_v19 }
  0x73   :  { %v609_v27 = vmul.u32 3266489909, %v545_v20  ;;  %991 = vst [vmem:[#allocation7 + $0xa0] sm:$0xff] %v927_v24  ;;  %992 = vst [vmem:[#allocation7 + $0xa8] sm:$0xff] %v928_v25  ;;  %v418_v28 = vmul.u32 2246822507, %v354_v17 }
  0x74   :  { %v419_v29 = vmul.u32 2246822507, %v355_v18  ;;  %v48_v30 = vadd.s32 120, %v1165_v1  ;;  %v1291_v31 = vadd.s32 128, %v1165_v1  ;;  %v672_v32 = vshrl.u32 %v608_v26, 16 }
  0x75   :  { %v673_v33 = vshrl.u32 %v609_v27, 16  ;;  %v117_v34 = vmul.u32 256, %v46_v61  ;;  %v118_v35 = vmul.u32 256, %v47_v62  ;;  %v482_v36 = vshrl.u32 %v418_v28, 13 }
  0x76   :  { %v483_v37 = vshrl.u32 %v419_v29, 13  ;;  %v119_v38 = vmul.u32 256, %v48_v30  ;;  %v120_v39 = vmul.u32 256, %v1291_v31  ;;  %v736_v40 = vxor.u32 %v672_v32, %v608_v26 }
  0x77   :  { %v737_v42 = vxor.u32 %v673_v33, %v609_v27  ;;  %v162_v44 = vadd.s32 %v117_v34, %v1167_v2  ;;  %v163_v45 = vadd.s32 %v117_v34, %v1171_v4  ;;  %v546_v46 = vxor.u32 %v482_v36, %v418_v28 }
  0x78   :  { %v547_v49 = vxor.u32 %v483_v37, %v419_v29  ;;  %v164_v50 = vadd.s32 %v118_v35, %v1167_v2  ;;  %v165_v53 = vadd.s32 %v118_v35, %v1171_v4  ;;  %vm801_vm6 = vcmp.ge.u32.totalorder %v736_v40, %v1179_v13 }
  0x79   :  { %vm802_vm7 = vcmp.ge.u32.totalorder %v737_v42, %v1179_v13  ;;  %v228_v54 = vxor.u32 %v1191_v21, %v162_v44  ;;  %v229_v57 = vxor.u32 %v1191_v21, %v163_v45  ;;  %v929_v58 = vsel %vm801_vm6, %v865_v41, 0.0 }
  0x7a   :  { %v930_v59 = vsel %vm802_vm7, %v866_v43, 0.0  ;;  %v610_v60 = vmul.u32 3266489909, %v546_v46  ;;  %v611_v47 = vmul.u32 3266489909, %v547_v49  ;;  %993 = vst [vmem:[#allocation7 + $0xb0] sm:$0xff] %v929_v58  ;;  %v230_v62 = vxor.u32 %v1191_v21, %v164_v50 }
  0x7b   :  { %994 = vst [vmem:[#allocation7 + $0xb8] sm:$0xff] %v930_v59  ;;  %v292_v48 = vshrl.u32 %v228_v54, 16  ;;  %v293_v61 = vshrl.u32 %v229_v57, 16  ;;  %v231_v63 = vxor.u32 %v1191_v21, %v165_v53  ;;  %v166_v5 = vadd.s32 %v119_v38, %v1167_v2 }
  0x7c   :  { %v674_v0 = vshrl.u32 %v610_v60, 16  ;;  %v675_v3 = vshrl.u32 %v611_v47, 16  ;;  %v167_v6 = vadd.s32 %v119_v38, %v1171_v4  ;;  %v294_v9 = vshrl.u32 %v230_v62, 16 }
  0x7d   :  { %v356_v7 = vxor.u32 %v292_v48, %v228_v54  ;;  %v357_v8 = vxor.u32 %v293_v61, %v229_v57  ;;  %v295_v10 = vshrl.u32 %v231_v63, 16  ;;  %v232_v11 = vxor.u32 %v1191_v21, %v166_v5  ;;  %v870_v48 = vld [vmem:[#allocation4 + $0xd8] sm:$0xff] }
  0x7e   :  { %v738_v51 = vxor.u32 %v674_v0, %v610_v60  ;;  %v739_v16 = vxor.u32 %v675_v3, %v611_v47  ;;  %v233_v12 = vxor.u32 %v1191_v21, %v167_v6  ;;  %v358_v14 = vxor.u32 %v294_v9, %v230_v62  ;;  %v869_v60 = vld [vmem:[#allocation4 + $0xd0] sm:$0xff] }
  0x7f   :  { %v420_v55 = vmul.u32 2246822507, %v356_v7  ;;  %v421_v56 = vmul.u32 2246822507, %v357_v8  ;;  %v359_v17 = vxor.u32 %v295_v10, %v231_v63  ;;  %v296_v18 = vshrl.u32 %v232_v11, 16 }
  0x80   :  { %vm803_vm8 = vcmp.ge.u32.totalorder %v738_v51, %v1179_v13  ;;  %vm804_vm9 = vcmp.ge.u32.totalorder %v739_v16, %v1179_v13  ;;  %v297_v19 = vshrl.u32 %v233_v12, 16  ;;  %v422_v25 = vmul.u32 2246822507, %v358_v14  ;;  %v871_v51 = vld [vmem:[#allocation4 + $0xe0] sm:$0xff]  ;;  %v872_v16 = vld [vmem:[#allocation4 + $0xe8] sm:$0xff] }
  0x81   :  { %v931_v20 = vsel %vm803_vm8, %v867_v15, 0.0  ;;  %v932_v22 = vsel %vm804_vm9, %v868_v52, 0.0  ;;  %v484_v23 = vshrl.u32 %v420_v55, 13  ;;  %v485_v24 = vshrl.u32 %v421_v56, 13 }
  0x82   :  { %995 = vst [vmem:[#allocation7 + $0xc0] sm:$0xff] %v931_v20  ;;  %996 = vst [vmem:[#allocation7 + $0xc8] sm:$0xff] %v932_v22  ;;  %v423_v26 = vmul.u32 2246822507, %v359_v17  ;;  %v360_v27 = vxor.u32 %v296_v18, %v232_v11  ;;  %v361_v28 = vxor.u32 %v297_v19, %v233_v12  ;;  %v168_v31 = vadd.s32 %v120_v39, %v1167_v2  ;;  %v873_v20 = vld [vmem:[#allocation4 + $0xf0] sm:$0xff] }
  0x83   :  { %v548_v29 = vxor.u32 %v484_v23, %v420_v55  ;;  %v549_v30 = vxor.u32 %v485_v24, %v421_v56  ;;  %v169_v32 = vadd.s32 %v120_v39, %v1171_v4  ;;  %v486_v33 = vshrl.u32 %v422_v25, 13  ;;  %v874_v23 = vld [vmem:[#allocation4 + $0xf8] sm:$0xff] }
  0x84   :  { %v487_v34 = vshrl.u32 %v423_v26, 13  ;;  %v424_v35 = vmul.u32 2246822507, %v360_v27  ;;  %v425_v36 = vmul.u32 2246822507, %v361_v28  ;;  %v234_v40 = vxor.u32 %v1191_v21, %v168_v31 }
  0x85   :  { %v612_v37 = vmul.u32 3266489909, %v548_v29  ;;  %v613_v38 = vmul.u32 3266489909, %v549_v30  ;;  %v235_v41 = vxor.u32 %v1191_v21, %v169_v32  ;;  %v550_v42 = vxor.u32 %v486_v33, %v422_v25 }
  0x86   :  { %v551_v43 = vxor.u32 %v487_v34, %v423_v26  ;;  %v488_v44 = vshrl.u32 %v424_v35, 13  ;;  %v489_v45 = vshrl.u32 %v425_v36, 13  ;;  %v298_v50 = vshrl.u32 %v234_v40, 16 }
  0x87   :  { %v676_v46 = vshrl.u32 %v612_v37, 16  ;;  %v677_v49 = vshrl.u32 %v613_v38, 16  ;;  %v299_v53 = vshrl.u32 %v235_v41, 16  ;;  %v614_v54 = vmul.u32 3266489909, %v550_v42 }
  0x88   :  { %v615_v39 = vmul.u32 3266489909, %v551_v43  ;;  %v552_v57 = vxor.u32 %v488_v44, %v424_v35  ;;  %v553_v58 = vxor.u32 %v489_v45, %v425_v36  ;;  %v362_v61 = vxor.u32 %v298_v50, %v234_v40  ;;  %v875_v50 = vld [vmem:[#allocation4 + $0x100] sm:$0xff] }
  0x89   :  { %v740_v59 = vxor.u32 %v676_v46, %v612_v37  ;;  %v741_v47 = vxor.u32 %v677_v49, %v613_v38  ;;  %v363_v62 = vxor.u32 %v299_v53, %v235_v41  ;;  %v678_v63 = vshrl.u32 %v614_v54, 16 }
  0x8a   :  { %v679_v0 = vshrl.u32 %v615_v39, 16  ;;  %v616_v3 = vmul.u32 3266489909, %v552_v57  ;;  %v617_v5 = vmul.u32 3266489909, %v553_v58  ;;  %v50_v56 = vadd.s32 136, %v1165_v1 }
  0x8b   :  { %vm805_vm10 = vcmp.ge.u32.totalorder %v740_v59, %v1179_v13  ;;  %vm806_vm11 = vcmp.ge.u32.totalorder %v741_v47, %v1179_v13  ;;  %v426_v6 = vmul.u32 2246822507, %v362_v61  ;;  %v427_v7 = vmul.u32 2246822507, %v363_v62 }
  0x8c   :  { %v933_v8 = vsel %vm805_vm10, %v869_v60, 0.0  ;;  %v934_v9 = vsel %vm806_vm11, %v870_v48, 0.0  ;;  %v742_v10 = vxor.u32 %v678_v63, %v614_v54  ;;  %v743_v15 = vxor.u32 %v679_v0, %v615_v39  ;;  %v876_v54 = vld [vmem:[#allocation4 + $0x108] sm:$0xff] }
  0x8d   :  { %997 = vst [vmem:[#allocation7 + $0xd0] sm:$0xff] %v933_v8  ;;  %998 = vst [vmem:[#allocation7 + $0xd8] sm:$0xff] %v934_v9  ;;  %v680_v52 = vshrl.u32 %v616_v3, 16  ;;  %v681_v11 = vshrl.u32 %v617_v5, 16  ;;  %v490_v12 = vshrl.u32 %v426_v6, 13  ;;  %v491_v55 = vshrl.u32 %v427_v7, 13 }
  0x8e   :  { %vm807_vm12 = vcmp.ge.u32.totalorder %v742_v10, %v1179_v13  ;;  %vm808_vm13 = vcmp.ge.u32.totalorder %v743_v15, %v1179_v13  ;;  %v51_v14 = vadd.s32 144, %v1165_v1  ;;  %v121_v26 = vmul.u32 256, %v50_v56 }
  0x8f   :  { %v935_v17 = vsel %vm807_vm12, %v871_v51, 0.0  ;;  %v936_v18 = vsel %vm808_vm13, %v872_v16, 0.0  ;;  %v744_v19 = vxor.u32 %v680_v52, %v616_v3  ;;  %v745_v22 = vxor.u32 %v681_v11, %v617_v5 }
  0x90   :  { %999 = vst [vmem:[#allocation7 + $0xe0] sm:$0xff] %v935_v17  ;;  %1000 = vst [vmem:[#allocation7 + $0xe8] sm:$0xff] %v936_v18  ;;  %v554_v24 = vxor.u32 %v490_v12, %v426_v6  ;;  %v555_v25 = vxor.u32 %v491_v55, %v427_v7  ;;  %v122_v27 = vmul.u32 256, %v51_v14  ;;  %v52_v28 = vadd.s32 152, %v1165_v1 }
  0x91   :  { %vm809_vm14 = vcmp.ge.u32.totalorder %v744_v19, %v1179_v13  ;;  %vm810_vm15 = vcmp.ge.u32.totalorder %v745_v22, %v1179_v13  ;;  %v53_v29 = vadd.s32 160, %v1165_v1  ;;  %v170_v34 = vadd.s32 %v121_v26, %v1167_v2 }
  0x92   :  { %v937_v30 = vsel %vm809_vm14, %v873_v20, 0.0  ;;  %v938_v31 = vsel %vm810_vm15, %v874_v23, 0.0  ;;  %v618_v32 = vmul.u32 3266489909, %v554_v24  ;;  %v619_v33 = vmul.u32 3266489909, %v555_v25 }
  0x93   :  { %1001 = vst [vmem:[#allocation7 + $0xf0] sm:$0xff] %v937_v30  ;;  %1002 = vst [vmem:[#allocation7 + $0xf8] sm:$0xff] %v938_v31  ;;  %v171_v35 = vadd.s32 %v121_v26, %v1171_v4  ;;  %v172_v36 = vadd.s32 %v122_v27, %v1167_v2  ;;  %v173_v37 = vadd.s32 %v122_v27, %v1171_v4  ;;  %v123_v41 = vmul.u32 256, %v52_v28 }
  0x94   :  { %v682_v38 = vshrl.u32 %v618_v32, 16  ;;  %v683_v40 = vshrl.u32 %v619_v33, 16  ;;  %v124_v42 = vmul.u32 256, %v53_v29  ;;  %v236_v43 = vxor.u32 %v1191_v21, %v170_v34 }
  0x95   :  { %v237_v44 = vxor.u32 %v1191_v21, %v171_v35  ;;  %v238_v45 = vxor.u32 %v1191_v21, %v172_v36  ;;  %v239_v46 = vxor.u32 %v1191_v21, %v173_v37  ;;  %v174_v39 = vadd.s32 %v123_v41, %v1167_v2 }
  0x96   :  { %v746_v49 = vxor.u32 %v682_v38, %v618_v32  ;;  %v747_v53 = vxor.u32 %v683_v40, %v619_v33  ;;  %v175_v57 = vadd.s32 %v123_v41, %v1171_v4  ;;  %v300_v58 = vshrl.u32 %v236_v43, 16 }
  0x97   :  { %v301_v59 = vshrl.u32 %v237_v44, 16  ;;  %v302_v60 = vshrl.u32 %v238_v45, 16  ;;  %v303_v47 = vshrl.u32 %v239_v46, 16  ;;  %v240_v48 = vxor.u32 %v1191_v21, %v174_v39  ;;  %v878_v39 = vld [vmem:[#allocation4 + $0x118] sm:$0xff] }
  0x98   :  { %vm811_vm0 = vcmp.ge.u32.totalorder %v746_v49, %v1179_v13  ;;  %vm812_vm1 = vcmp.ge.u32.totalorder %v747_v53, %v1179_v13  ;;  %v241_v61 = vxor.u32 %v1191_v21, %v175_v57  ;;  %v364_v0 = vxor.u32 %v300_v58, %v236_v43  ;;  %v877_v53 = vld [vmem:[#allocation4 + $0x110] sm:$0xff] }
  0x99   :  { %v939_v62 = vsel %vm811_vm0, %v875_v50, 0.0  ;;  %v940_v63 = vsel %vm812_vm1, %v876_v54, 0.0  ;;  %v365_v3 = vxor.u32 %v301_v59, %v237_v44  ;;  %v366_v5 = vxor.u32 %v302_v60, %v238_v45  ;;  %v879_v60 = vld [vmem:[#allocation4 + $0x120] sm:$0xff] }
  0x9a   :  { %1003 = vst [vmem:[#allocation7 + $0x100] sm:$0xff] %v939_v62  ;;  %1004 = vst [vmem:[#allocation7 + $0x108] sm:$0xff] %v940_v63  ;;  %v367_v6 = vxor.u32 %v303_v47, %v239_v46  ;;  %v304_v7 = vshrl.u32 %v240_v48, 16  ;;  %v305_v8 = vshrl.u32 %v241_v61, 16  ;;  %v428_v9 = vmul.u32 2246822507, %v364_v0 }
  0x9b   :  { %v429_v10 = vmul.u32 2246822507, %v365_v3  ;;  %v176_v51 = vadd.s32 %v124_v42, %v1167_v2  ;;  %v177_v15 = vadd.s32 %v124_v42, %v1171_v4  ;;  %v430_v16 = vmul.u32 2246822507, %v366_v5 }
  0x9c   :  { %v431_v52 = vmul.u32 2246822507, %v367_v6  ;;  %v368_v11 = vxor.u32 %v304_v7, %v240_v48  ;;  %v369_v12 = vxor.u32 %v305_v8, %v241_v61  ;;  %v492_v55 = vshrl.u32 %v428_v9, 13  ;;  %v880_v48 = vld [vmem:[#allocation4 + $0x128] sm:$0xff] }
  0x9d   :  { %v493_v56 = vshrl.u32 %v429_v10, 13  ;;  %v242_v14 = vxor.u32 %v1191_v21, %v176_v51  ;;  %v243_v17 = vxor.u32 %v1191_v21, %v177_v15  ;;  %v494_v18 = vshrl.u32 %v430_v16, 13  ;;  %v882_v51 = vld [vmem:[#allocation4 + $0x138] sm:$0xff] }
  0x9e   :  { %v495_v19 = vshrl.u32 %v431_v52, 13  ;;  %v432_v20 = vmul.u32 2246822507, %v368_v11  ;;  %v433_v22 = vmul.u32 2246822507, %v369_v12  ;;  %v556_v23 = vxor.u32 %v492_v55, %v428_v9  ;;  %v881_v9 = vld [vmem:[#allocation4 + $0x130] sm:$0xff] }
  0x9f   :  { %v557_v24 = vxor.u32 %v493_v56, %v429_v10  ;;  %v306_v25 = vshrl.u32 %v242_v14, 16  ;;  %v307_v26 = vshrl.u32 %v243_v17, 16  ;;  %v558_v27 = vxor.u32 %v494_v18, %v430_v16 }
  0xa0   :  { %v559_v28 = vxor.u32 %v495_v19, %v431_v52  ;;  %v496_v29 = vshrl.u32 %v432_v20, 13  ;;  %v497_v30 = vshrl.u32 %v433_v22, 13  ;;  %v620_v31 = vmul.u32 3266489909, %v556_v23 }
  0xa1   :  { %v621_v32 = vmul.u32 3266489909, %v557_v24  ;;  %v370_v33 = vxor.u32 %v306_v25, %v242_v14  ;;  %v371_v34 = vxor.u32 %v307_v26, %v243_v17  ;;  %v622_v35 = vmul.u32 3266489909, %v558_v27  ;;  %v883_v25 = vld [vmem:[#allocation4 + $0x140] sm:$0xff]  ;;  %v884_v27 = vld [vmem:[#allocation4 + $0x148] sm:$0xff] }
  0xa2   :  { %v623_v36 = vmul.u32 3266489909, %v559_v28  ;;  %v560_v37 = vxor.u32 %v496_v29, %v432_v20  ;;  %v561_v38 = vxor.u32 %v497_v30, %v433_v22  ;;  %v684_v40 = vshrl.u32 %v620_v31, 16 }
  0xa3   :  { %v685_v41 = vshrl.u32 %v621_v32, 16  ;;  %v434_v42 = vmul.u32 2246822507, %v370_v33  ;;  %v435_v43 = vmul.u32 2246822507, %v371_v34  ;;  %v686_v44 = vshrl.u32 %v622_v35, 16 }
  0xa4   :  { %v687_v45 = vshrl.u32 %v623_v36, 16  ;;  %v624_v46 = vmul.u32 3266489909, %v560_v37  ;;  %v625_v49 = vmul.u32 3266489909, %v561_v38  ;;  %v748_v50 = vxor.u32 %v684_v40, %v620_v31 }
  0xa5   :  { %v749_v54 = vxor.u32 %v685_v41, %v621_v32  ;;  %v498_v57 = vshrl.u32 %v434_v42, 13  ;;  %v499_v58 = vshrl.u32 %v435_v43, 13  ;;  %v750_v59 = vxor.u32 %v686_v44, %v622_v35 }
  0xa6   :  { %v751_v47 = vxor.u32 %v687_v45, %v623_v36  ;;  %v688_v61 = vshrl.u32 %v624_v46, 16  ;;  %v689_v62 = vshrl.u32 %v625_v49, 16  ;;  %vm813_vm2 = vcmp.ge.u32.totalorder %v748_v50, %v1179_v13 }
  0xa7   :  { %vm814_vm3 = vcmp.ge.u32.totalorder %v749_v54, %v1179_v13  ;;  %v562_v63 = vxor.u32 %v498_v57, %v434_v42  ;;  %v563_v0 = vxor.u32 %v499_v58, %v435_v43  ;;  %v941_v3 = vsel %vm813_vm2, %v877_v53, 0.0 }
  0xa8   :  { %v942_v5 = vsel %vm814_vm3, %v878_v39, 0.0  ;;  %vm815_vm4 = vcmp.ge.u32.totalorder %v750_v59, %v1179_v13  ;;  %vm816_vm5 = vcmp.ge.u32.totalorder %v751_v47, %v1179_v13  ;;  %1005 = vst [vmem:[#allocation7 + $0x110] sm:$0xff] %v941_v3  ;;  %v752_v8 = vxor.u32 %v688_v61, %v624_v46 }
  0xa9   :  { %1006 = vst [vmem:[#allocation7 + $0x118] sm:$0xff] %v942_v5  ;;  %v943_v6 = vsel %vm815_vm4, %v879_v60, 0.0  ;;  %v944_v7 = vsel %vm816_vm5, %v880_v48, 0.0  ;;  %v753_v10 = vxor.u32 %v689_v62, %v625_v49  ;;  %v626_v15 = vmul.u32 3266489909, %v562_v63 }
  0xaa   :  { %1007 = vst [vmem:[#allocation7 + $0x120] sm:$0xff] %v943_v6  ;;  %1008 = vst [vmem:[#allocation7 + $0x128] sm:$0xff] %v944_v7  ;;  %v627_v16 = vmul.u32 3266489909, %v563_v0  ;;  %v54_v52 = vadd.s32 168, %v1165_v1  ;;  %v55_v11 = vadd.s32 176, %v1165_v1  ;;  %vm817_vm6 = vcmp.ge.u32.totalorder %v752_v8, %v1179_v13 }
  0xab   :  { %vm818_vm7 = vcmp.ge.u32.totalorder %v753_v10, %v1179_v13  ;;  %v56_v12 = vadd.s32 184, %v1165_v1  ;;  %v57_v55 = vadd.s32 192, %v1165_v1  ;;  %v945_v56 = vsel %vm817_vm6, %v881_v9, 0.0 }
  0xac   :  { %v946_v14 = vsel %vm818_vm7, %v882_v51, 0.0  ;;  %v690_v17 = vshrl.u32 %v626_v15, 16  ;;  %v691_v18 = vshrl.u32 %v627_v16, 16  ;;  %1009 = vst [vmem:[#allocation7 + $0x130] sm:$0xff] %v945_v56  ;;  %v125_v19 = vmul.u32 256, %v54_v52 }
  0xad   :  { %1010 = vst [vmem:[#allocation7 + $0x138] sm:$0xff] %v946_v14  ;;  %v126_v20 = vmul.u32 256, %v55_v11  ;;  %v1353_v22 = vadd.s32 200, %v1165_v1  ;;  %v1356_v23 = vadd.s32 208, %v1165_v1  ;;  %v127_v28 = vmul.u32 256, %v56_v12 }
  0xae   :  { %v754_v24 = vxor.u32 %v690_v17, %v626_v15  ;;  %v755_v26 = vxor.u32 %v691_v18, %v627_v16  ;;  %v128_v29 = vmul.u32 256, %v57_v55  ;;  %v178_v30 = vadd.s32 %v125_v19, %v1167_v2 }
  0xaf   :  { %v179_v31 = vadd.s32 %v125_v19, %v1171_v4  ;;  %v180_v32 = vadd.s32 %v126_v20, %v1167_v2  ;;  %v181_v33 = vadd.s32 %v126_v20, %v1171_v4  ;;  %v182_v34 = vadd.s32 %v127_v28, %v1167_v2 }
  0xb0   :  { %vm819_vm8 = vcmp.ge.u32.totalorder %v754_v24, %v1179_v13  ;;  %vm820_vm9 = vcmp.ge.u32.totalorder %v755_v26, %v1179_v13  ;;  %v183_v35 = vadd.s32 %v127_v28, %v1171_v4  ;;  %v244_v38 = vxor.u32 %v1191_v21, %v178_v30 }
  0xb1   :  { %v947_v36 = vsel %vm819_vm8, %v883_v25, 0.0  ;;  %v948_v37 = vsel %vm820_vm9, %v884_v27, 0.0  ;;  %v245_v40 = vxor.u32 %v1191_v21, %v179_v31  ;;  %v246_v41 = vxor.u32 %v1191_v21, %v180_v32 }
  0xb2   :  { %1011 = vst [vmem:[#allocation7 + $0x140] sm:$0xff] %v947_v36  ;;  %1012 = vst [vmem:[#allocation7 + $0x148] sm:$0xff] %v948_v37  ;;  %v247_v42 = vxor.u32 %v1191_v21, %v181_v33  ;;  %v248_v43 = vxor.u32 %v1191_v21, %v182_v34  ;;  %v249_v44 = vxor.u32 %v1191_v21, %v183_v35  ;;  %v308_v45 = vshrl.u32 %v244_v38, 16 }
  0xb3   :  { %v309_v46 = vshrl.u32 %v245_v40, 16  ;;  %v184_v49 = vadd.s32 %v128_v29, %v1167_v2  ;;  %v185_v50 = vadd.s32 %v128_v29, %v1171_v4  ;;  %v310_v53 = vshrl.u32 %v246_v41, 16 }
  0xb4   :  { %v311_v54 = vshrl.u32 %v247_v42, 16  ;;  %v312_v39 = vshrl.u32 %v248_v43, 16  ;;  %v313_v57 = vshrl.u32 %v249_v44, 16  ;;  %v372_v58 = vxor.u32 %v308_v45, %v244_v38  ;;  %v885_v45 = vld [vmem:[#allocation4 + $0x150] sm:$0xff] }
  0xb5   :  { %v373_v59 = vxor.u32 %v309_v46, %v245_v40  ;;  %v250_v60 = vxor.u32 %v1191_v21, %v184_v49  ;;  %v251_v47 = vxor.u32 %v1191_v21, %v185_v50  ;;  %v374_v48 = vxor.u32 %v310_v53, %v246_v41  ;;  %v886_v49 = vld [vmem:[#allocation4 + $0x158] sm:$0xff] }
  0xb6   :  { %v375_v61 = vxor.u32 %v311_v54, %v247_v42  ;;  %v376_v62 = vxor.u32 %v312_v39, %v248_v43  ;;  %v377_v63 = vxor.u32 %v313_v57, %v249_v44  ;;  %v436_v0 = vmul.u32 2246822507, %v372_v58  ;;  %v887_v39 = vld [vmem:[#allocation4 + $0x160] sm:$0xff]  ;;  %v888_v58 = vld [vmem:[#allocation4 + $0x168] sm:$0xff] }
  0xb7   :  { %v437_v3 = vmul.u32 2246822507, %v373_v59  ;;  %v314_v5 = vshrl.u32 %v250_v60, 16  ;;  %v315_v6 = vshrl.u32 %v251_v47, 16  ;;  %v438_v7 = vmul.u32 2246822507, %v374_v48 }
  0xb8   :  { %v439_v8 = vmul.u32 2246822507, %v375_v61  ;;  %v1377_v9 = vadd.s32 216, %v1165_v1  ;;  %v1380_v10 = vadd.s32 224, %v1165_v1  ;;  %v500_v51 = vshrl.u32 %v436_v0, 13  ;;  %v889_v48 = vld [vmem:[#allocation4 + $0x170] sm:$0xff] }
  0xb9   :  { %v501_v15 = vshrl.u32 %v437_v3, 13  ;;  %v440_v16 = vmul.u32 2246822507, %v376_v62  ;;  %v441_v52 = vmul.u32 2246822507, %v377_v63  ;;  %v502_v11 = vshrl.u32 %v438_v7, 13 }
  0xba   :  { %v503_v12 = vshrl.u32 %v439_v8, 13  ;;  %v378_v55 = vxor.u32 %v314_v5, %v250_v60  ;;  %v379_v56 = vxor.u32 %v315_v6, %v251_v47  ;;  %v564_v14 = vxor.u32 %v500_v51, %v436_v0  ;;  %v890_v62 = vld [vmem:[#allocation4 + $0x178] sm:$0xff] }
  0xbb   :  { %v565_v17 = vxor.u32 %v501_v15, %v437_v3  ;;  %v504_v18 = vshrl.u32 %v440_v16, 13  ;;  %v505_v19 = vshrl.u32 %v441_v52, 13  ;;  %v566_v20 = vxor.u32 %v502_v11, %v438_v7 }
  0xbc   :  { %v567_v24 = vxor.u32 %v503_v12, %v439_v8  ;;  %v442_v25 = vmul.u32 2246822507, %v378_v55  ;;  %v443_v26 = vmul.u32 2246822507, %v379_v56  ;;  %v891_v12 = vld [vmem:[#allocation4 + $0x180] sm:$0xff]  ;;  %v892_v56 = vld [vmem:[#allocation4 + $0x188] sm:$0xff] }
  0xbd   :  { %v628_v27 = vmul.u32 3266489909, %v564_v14  ;;  %v629_v28 = vmul.u32 3266489909, %v565_v17  ;;  %v568_v29 = vxor.u32 %v504_v18, %v440_v16  ;;  %v569_v30 = vxor.u32 %v505_v19, %v441_v52 }
  0xbe   :  { %v630_v31 = vmul.u32 3266489909, %v566_v20  ;;  %v631_v32 = vmul.u32 3266489909, %v567_v24  ;;  %v506_v33 = vshrl.u32 %v442_v25, 13  ;;  %v507_v34 = vshrl.u32 %v443_v26, 13 }
  0xbf   :  { %v692_v35 = vshrl.u32 %v628_v27, 16  ;;  %v693_v36 = vshrl.u32 %v629_v28, 16  ;;  %v632_v37 = vmul.u32 3266489909, %v568_v29  ;;  %v633_v38 = vmul.u32 3266489909, %v569_v30 }
  0xc0   :  { %v694_v40 = vshrl.u32 %v630_v31, 16  ;;  %v695_v41 = vshrl.u32 %v631_v32, 16  ;;  %v570_v42 = vxor.u32 %v506_v33, %v442_v25  ;;  %v571_v43 = vxor.u32 %v507_v34, %v443_v26 }
  0xc1   :  { %v756_v44 = vxor.u32 %v692_v35, %v628_v27  ;;  %v757_v46 = vxor.u32 %v693_v36, %v629_v28  ;;  %v696_v50 = vshrl.u32 %v632_v37, 16  ;;  %v697_v53 = vshrl.u32 %v633_v38, 16 }
  0xc2   :  { %v758_v54 = vxor.u32 %v694_v40, %v630_v31  ;;  %v759_v57 = vxor.u32 %v695_v41, %v631_v32  ;;  %v634_v59 = vmul.u32 3266489909, %v570_v42  ;;  %v635_v60 = vmul.u32 3266489909, %v571_v43 }
  0xc3   :  { %vm821_vm10 = vcmp.ge.u32.totalorder %v756_v44, %v1179_v13  ;;  %vm822_vm11 = vcmp.ge.u32.totalorder %v757_v46, %v1179_v13  ;;  %v760_v47 = vxor.u32 %v696_v50, %v632_v37  ;;  %v761_v61 = vxor.u32 %v697_v53, %v633_v38 }
  0xc4   :  { %v949_v63 = vsel %vm821_vm10, %v885_v45, 0.0  ;;  %v950_v0 = vsel %vm822_vm11, %v886_v49, 0.0  ;;  %vm823_vm12 = vcmp.ge.u32.totalorder %v758_v54, %v1179_v13  ;;  %vm824_vm13 = vcmp.ge.u32.totalorder %v759_v57, %v1179_v13 }
  0xc5   :  { %1013 = vst [vmem:[#allocation7 + $0x150] sm:$0xff] %v949_v63  ;;  %1014 = vst [vmem:[#allocation7 + $0x158] sm:$0xff] %v950_v0  ;;  %v951_v3 = vsel %vm823_vm12, %v887_v39, 0.0  ;;  %v952_v5 = vsel %vm824_vm13, %v888_v58, 0.0  ;;  %vm825_vm14 = vcmp.ge.u32.totalorder %v760_v47, %v1179_v13  ;;  %vm826_vm15 = vcmp.ge.u32.totalorder %v761_v61, %v1179_v13 }
  0xc6   :  { %1015 = vst [vmem:[#allocation7 + $0x160] sm:$0xff] %v951_v3  ;;  %1016 = vst [vmem:[#allocation7 + $0x168] sm:$0xff] %v952_v5  ;;  %v953_v6 = vsel %vm825_vm14, %v889_v48, 0.0  ;;  %v954_v7 = vsel %vm826_vm15, %v890_v62, 0.0  ;;  %v698_v8 = vshrl.u32 %v634_v59, 16  ;;  %v699_v51 = vshrl.u32 %v635_v60, 16 }
  0xc7   :  { %1017 = vst [vmem:[#allocation7 + $0x170] sm:$0xff] %v953_v6  ;;  %1018 = vst [vmem:[#allocation7 + $0x178] sm:$0xff] %v954_v7  ;;  %v129_v15 = vmul.u32 256, %v1353_v22  ;;  %v130_v16 = vmul.u32 256, %v1356_v23  ;;  %v1391_v52 = vadd.s32 232, %v1165_v1 }
  0xc8   :  { %v762_v11 = vxor.u32 %v698_v8, %v634_v59  ;;  %v763_v55 = vxor.u32 %v699_v51, %v635_v60  ;;  %v131_v14 = vmul.u32 256, %v1377_v9  ;;  %v132_v17 = vmul.u32 256, %v1380_v10 }
  0xc9   :  { %v186_v18 = vadd.s32 %v129_v15, %v1167_v2  ;;  %v187_v19 = vadd.s32 %v129_v15, %v1171_v4  ;;  %v188_v20 = vadd.s32 %v130_v16, %v1167_v2  ;;  %v189_v22 = vadd.s32 %v130_v16, %v1171_v4 }
  0xca   :  { %vm827_vm0 = vcmp.ge.u32.totalorder %v762_v11, %v1179_v13  ;;  %vm828_vm1 = vcmp.ge.u32.totalorder %v763_v55, %v1179_v13  ;;  %v190_v23 = vadd.s32 %v131_v14, %v1167_v2  ;;  %v191_v24 = vadd.s32 %v131_v14, %v1171_v4 }
  0xcb   :  { %v955_v25 = vsel %vm827_vm0, %v891_v12, 0.0  ;;  %v956_v9 = vsel %vm828_vm1, %v892_v56, 0.0  ;;  %v252_v10 = vxor.u32 %v1191_v21, %v186_v18  ;;  %v253_v26 = vxor.u32 %v1191_v21, %v187_v19 }
  0xcc   :  { %1019 = vst [vmem:[#allocation7 + $0x180] sm:$0xff] %v955_v25  ;;  %1020 = vst [vmem:[#allocation7 + $0x188] sm:$0xff] %v956_v9  ;;  %v254_v27 = vxor.u32 %v1191_v21, %v188_v20  ;;  %v255_v28 = vxor.u32 %v1191_v21, %v189_v22  ;;  %v256_v29 = vxor.u32 %v1191_v21, %v190_v23  ;;  %v1414_v59 = vadd.s32 240, %v1165_v1 }
  0xcd   :  { %v257_v30 = vxor.u32 %v1191_v21, %v191_v24  ;;  %v316_v31 = vshrl.u32 %v252_v10, 16  ;;  %v317_v32 = vshrl.u32 %v253_v26, 16  ;;  %v192_v33 = vadd.s32 %v132_v17, %v1167_v2 }
  0xce   :  { %v193_v34 = vadd.s32 %v132_v17, %v1171_v4  ;;  %v318_v35 = vshrl.u32 %v254_v27, 16  ;;  %v319_v36 = vshrl.u32 %v255_v28, 16  ;;  %v320_v37 = vshrl.u32 %v256_v29, 16 }
  0xcf   :  { %v321_v38 = vshrl.u32 %v257_v30, 16  ;;  %v380_v40 = vxor.u32 %v316_v31, %v252_v10  ;;  %v381_v41 = vxor.u32 %v317_v32, %v253_v26  ;;  %v258_v42 = vxor.u32 %v1191_v21, %v192_v33  ;;  %v894_v31 = vld [vmem:[#allocation4 + $0x198] sm:$0xff] }
  0xd0   :  { %v259_v43 = vxor.u32 %v1191_v21, %v193_v34  ;;  %v382_v44 = vxor.u32 %v318_v35, %v254_v27  ;;  %v383_v45 = vxor.u32 %v319_v36, %v255_v28  ;;  %v384_v46 = vxor.u32 %v320_v37, %v256_v29  ;;  %v893_v29 = vld [vmem:[#allocation4 + $0x190] sm:$0xff]  ;;  %v895_v35 = vld [vmem:[#allocation4 + $0x1a0] sm:$0xff]  ;;  %v896_v37 = vld [vmem:[#allocation4 + $0x1a8] sm:$0xff] }
  0xd1   :  { %v385_v49 = vxor.u32 %v321_v38, %v257_v30  ;;  %v444_v50 = vmul.u32 2246822507, %v380_v40  ;;  %v445_v53 = vmul.u32 2246822507, %v381_v41  ;;  %v322_v54 = vshrl.u32 %v258_v42, 16 }
  0xd2   :  { %v323_v39 = vshrl.u32 %v259_v43, 16  ;;  %v446_v57 = vmul.u32 2246822507, %v382_v44  ;;  %v447_v58 = vmul.u32 2246822507, %v383_v45  ;;  %v1417_v60 = vadd.s32 248, %v1165_v1 }
  0xd3   :  { %v508_v47 = vshrl.u32 %v444_v50, 13  ;;  %v509_v48 = vshrl.u32 %v445_v53, 13  ;;  %v448_v61 = vmul.u32 2246822507, %v384_v46  ;;  %v449_v62 = vmul.u32 2246822507, %v385_v49 }
  0xd4   :  { %v510_v63 = vshrl.u32 %v446_v57, 13  ;;  %v511_v0 = vshrl.u32 %v447_v58, 13  ;;  %v386_v3 = vxor.u32 %v322_v54, %v258_v42  ;;  %v387_v5 = vxor.u32 %v323_v39, %v259_v43  ;;  %v897_v42 = vld [vmem:[#allocation4 + $0x1b0] sm:$0xff]  ;;  %v898_v44 = vld [vmem:[#allocation4 + $0x1b8] sm:$0xff] }
  0xd5   :  { %v572_v6 = vxor.u32 %v508_v47, %v444_v50  ;;  %v573_v7 = vxor.u32 %v509_v48, %v445_v53  ;;  %v512_v8 = vshrl.u32 %v448_v61, 13  ;;  %v513_v51 = vshrl.u32 %v449_v62, 13 }
  0xd6   :  { %v574_v15 = vxor.u32 %v510_v63, %v446_v57  ;;  %v575_v16 = vxor.u32 %v511_v0, %v447_v58  ;;  %v450_v11 = vmul.u32 2246822507, %v386_v3  ;;  %v451_v12 = vmul.u32 2246822507, %v387_v5  ;;  %v900_v63 = vld [vmem:[#allocation4 + $0x1c8] sm:$0xff] }
  0xd7   :  { %v636_v55 = vmul.u32 3266489909, %v572_v6  ;;  %v637_v56 = vmul.u32 3266489909, %v573_v7  ;;  %v576_v1 = vxor.u32 %v512_v8, %v448_v61  ;;  %v577_v14 = vxor.u32 %v513_v51, %v449_v62  ;;  %v899_v61 = vld [vmem:[#allocation4 + $0x1c0] sm:$0xff] }
  0xd8   :  { %v638_v17 = vmul.u32 3266489909, %v574_v15  ;;  %v639_v18 = vmul.u32 3266489909, %v575_v16  ;;  %v514_v19 = vshrl.u32 %v450_v11, 13  ;;  %v515_v20 = vshrl.u32 %v451_v12, 13 }
  0xd9   :  { %v700_v22 = vshrl.u32 %v636_v55, 16  ;;  %v701_v23 = vshrl.u32 %v637_v56, 16  ;;  %v640_v24 = vmul.u32 3266489909, %v576_v1  ;;  %v641_v25 = vmul.u32 3266489909, %v577_v14 }
  0xda   :  { %v702_v9 = vshrl.u32 %v638_v17, 16  ;;  %v703_v10 = vshrl.u32 %v639_v18, 16  ;;  %v578_v26 = vxor.u32 %v514_v19, %v450_v11  ;;  %v579_v27 = vxor.u32 %v515_v20, %v451_v12 }
  0xdb   :  { %v764_v28 = vxor.u32 %v700_v22, %v636_v55  ;;  %v765_v30 = vxor.u32 %v701_v23, %v637_v56  ;;  %v704_v32 = vshrl.u32 %v640_v24, 16  ;;  %v705_v33 = vshrl.u32 %v641_v25, 16 }
  0xdc   :  { %v766_v34 = vxor.u32 %v702_v9, %v638_v17  ;;  %v767_v36 = vxor.u32 %v703_v10, %v639_v18  ;;  %v642_v38 = vmul.u32 3266489909, %v578_v26  ;;  %v643_v40 = vmul.u32 3266489909, %v579_v27 }
  0xdd   :  { %vm829_vm2 = vcmp.ge.u32.totalorder %v764_v28, %v1179_v13  ;;  %vm830_vm3 = vcmp.ge.u32.totalorder %v765_v30, %v1179_v13  ;;  %v768_v41 = vxor.u32 %v704_v32, %v640_v24  ;;  %v769_v43 = vxor.u32 %v705_v33, %v641_v25 }
  0xde   :  { %v957_v45 = vsel %vm829_vm2, %v893_v29, 0.0  ;;  %v958_v46 = vsel %vm830_vm3, %v894_v31, 0.0  ;;  %vm831_vm4 = vcmp.ge.u32.totalorder %v766_v34, %v1179_v13  ;;  %vm832_vm5 = vcmp.ge.u32.totalorder %v767_v36, %v1179_v13 }
  0xdf   :  { %1021 = vst [vmem:[#allocation7 + $0x190] sm:$0xff] %v957_v45  ;;  %1022 = vst [vmem:[#allocation7 + $0x198] sm:$0xff] %v958_v46  ;;  %v959_v49 = vsel %vm831_vm4, %v895_v35, 0.0  ;;  %v960_v50 = vsel %vm832_vm5, %v896_v37, 0.0  ;;  %vm833_vm6 = vcmp.ge.u32.totalorder %v768_v41, %v1179_v13  ;;  %vm834_vm7 = vcmp.ge.u32.totalorder %v769_v43, %v1179_v13 }
  0xe0   :  { %1023 = vst [vmem:[#allocation7 + $0x1a0] sm:$0xff] %v959_v49  ;;  %1024 = vst [vmem:[#allocation7 + $0x1a8] sm:$0xff] %v960_v50  ;;  %v961_v53 = vsel %vm833_vm6, %v897_v42, 0.0  ;;  %v962_v54 = vsel %vm834_vm7, %v898_v44, 0.0  ;;  %v706_v39 = vshrl.u32 %v642_v38, 16  ;;  %v707_v57 = vshrl.u32 %v643_v40, 16 }
  0xe1   :  { %1025 = vst [vmem:[#allocation7 + $0x1b0] sm:$0xff] %v961_v53  ;;  %1026 = vst [vmem:[#allocation7 + $0x1b8] sm:$0xff] %v962_v54  ;;  %v133_v58 = vmul.u32 256, %v1391_v52  ;;  %v134_v47 = vmul.u32 256, %v1414_v59 }
  0xe2   :  { %v770_v48 = vxor.u32 %v706_v39, %v642_v38  ;;  %v771_v62 = vxor.u32 %v707_v57, %v643_v40  ;;  %v135_v0 = vmul.u32 256, %v1417_v60  ;;  %v901_v57 = vld [vmem:[#allocation4 + $0x1d0] sm:$0xff] }
  0xe3   :  { %v194_v3 = vadd.s32 %v133_v58, %v1167_v2  ;;  %v195_v5 = vadd.s32 %v133_v58, %v1171_v4  ;;  %v196_v6 = vadd.s32 %v134_v47, %v1167_v2  ;;  %v197_v7 = vadd.s32 %v134_v47, %v1171_v4  ;;  %v902_v47 = vld [vmem:[#allocation4 + $0x1d8] sm:$0xff] }
  0xe4   :  { %vm835_vm8 = vcmp.ge.u32.totalorder %v770_v48, %v1179_v13  ;;  %vm836_vm9 = vcmp.ge.u32.totalorder %v771_v62, %v1179_v13  ;;  %v198_v52 = vadd.s32 %v135_v0, %v1167_v2  ;;  %v199_v59 = vadd.s32 %v135_v0, %v1171_v4 }
  0xe5   :  { %v963_v8 = vsel %vm835_vm8, %v899_v61, 0.0  ;;  %v964_v51 = vsel %vm836_vm9, %v900_v63, 0.0  ;;  %v260_v60 = vxor.u32 %v1191_v21, %v194_v3  ;;  %v261_v15 = vxor.u32 %v1191_v21, %v195_v5  ;;  %v903_v63 = vld [vmem:[#allocation4 + $0x1e0] sm:$0xff]  ;;  %v904_v3 = vld [vmem:[#allocation4 + $0x1e8] sm:$0xff] }
  0xe6   :  { %1027 = vst [vmem:[#allocation7 + $0x1c0] sm:$0xff] %v963_v8  ;;  %1028 = vst [vmem:[#allocation7 + $0x1c8] sm:$0xff] %v964_v51  ;;  %v262_v16 = vxor.u32 %v1191_v21, %v196_v6  ;;  %v263_v11 = vxor.u32 %v1191_v21, %v197_v7  ;;  %v264_v12 = vxor.u32 %v1191_v21, %v198_v52  ;;  %v905_v6 = vld [vmem:[#allocation4 + $0x1f0] sm:$0xff]  ;;  %v906_v52 = vld [vmem:[#allocation4 + $0x1f8] sm:$0xff] }
  0xe7   :  { %v265_v55 = vxor.u32 %v1191_v21, %v199_v59  ;;  %v324_v56 = vshrl.u32 %v260_v60, 16  ;;  %v325_v2 = vshrl.u32 %v261_v15, 16 }
  0xe8   :  { %v326_v1 = vshrl.u32 %v262_v16, 16  ;;  %v327_v4 = vshrl.u32 %v263_v11, 16  ;;  %v328_v14 = vshrl.u32 %v264_v12, 16 }
  0xe9   :  { %v329_v17 = vshrl.u32 %v265_v55, 16  ;;  %v388_v18 = vxor.u32 %v324_v56, %v260_v60  ;;  %v389_v19 = vxor.u32 %v325_v2, %v261_v15 }
  0xea   :  { %v390_v20 = vxor.u32 %v326_v1, %v262_v16  ;;  %v391_v22 = vxor.u32 %v327_v4, %v263_v11  ;;  %v392_v23 = vxor.u32 %v328_v14, %v264_v12 }
  0xeb   :  { %v393_v24 = vxor.u32 %v329_v17, %v265_v55  ;;  %v452_v25 = vmul.u32 2246822507, %v388_v18  ;;  %v453_v9 = vmul.u32 2246822507, %v389_v19 }
  0xec   :  { %v454_v10 = vmul.u32 2246822507, %v390_v20  ;;  %v455_v26 = vmul.u32 2246822507, %v391_v22 }
  0xed   :  { %v516_v27 = vshrl.u32 %v452_v25, 13  ;;  %v517_v28 = vshrl.u32 %v453_v9, 13  ;;  %v456_v29 = vmul.u32 2246822507, %v392_v23  ;;  %v457_v21 = vmul.u32 2246822507, %v393_v24 }
  0xee   :  { %v518_v30 = vshrl.u32 %v454_v10, 13  ;;  %v519_v31 = vshrl.u32 %v455_v26, 13 }
  0xef   :  { %v580_v32 = vxor.u32 %v516_v27, %v452_v25  ;;  %v581_v33 = vxor.u32 %v517_v28, %v453_v9  ;;  %v520_v34 = vshrl.u32 %v456_v29, 13  ;;  %v521_v35 = vshrl.u32 %v457_v21, 13 }
  0xf0   :  { %v582_v36 = vxor.u32 %v518_v30, %v454_v10  ;;  %v583_v37 = vxor.u32 %v519_v31, %v455_v26 }
  0xf1   :  { %v644_v38 = vmul.u32 3266489909, %v580_v32  ;;  %v645_v40 = vmul.u32 3266489909, %v581_v33  ;;  %v584_v41 = vxor.u32 %v520_v34, %v456_v29  ;;  %v585_v42 = vxor.u32 %v521_v35, %v457_v21 }
  0xf2   :  { %v646_v43 = vmul.u32 3266489909, %v582_v36  ;;  %v647_v44 = vmul.u32 3266489909, %v583_v37 }
  0xf3   :  { %v708_v45 = vshrl.u32 %v644_v38, 16  ;;  %v709_v46 = vshrl.u32 %v645_v40, 16  ;;  %v648_v49 = vmul.u32 3266489909, %v584_v41  ;;  %v649_v50 = vmul.u32 3266489909, %v585_v42 }
  0xf4   :  { %v710_v53 = vshrl.u32 %v646_v43, 16  ;;  %v711_v54 = vshrl.u32 %v647_v44, 16 }
  0xf5   :  { %v772_v39 = vxor.u32 %v708_v45, %v644_v38  ;;  %v773_v58 = vxor.u32 %v709_v46, %v645_v40  ;;  %v712_v48 = vshrl.u32 %v648_v49, 16  ;;  %v713_v61 = vshrl.u32 %v649_v50, 16 }
  0xf6   :  { %v774_v62 = vxor.u32 %v710_v53, %v646_v43  ;;  %v775_v0 = vxor.u32 %v711_v54, %v647_v44 }
  0xf7   :  { %vm837_vm10 = vcmp.ge.u32.totalorder %v772_v39, %v1179_v13  ;;  %vm838_vm11 = vcmp.ge.u32.totalorder %v773_v58, %v1179_v13  ;;  %v776_v5 = vxor.u32 %v712_v48, %v648_v49  ;;  %v777_v7 = vxor.u32 %v713_v61, %v649_v50 }
  0xf8   :  { %v965_v59 = vsel %vm837_vm10, %v901_v57, 0.0  ;;  %v966_v8 = vsel %vm838_vm11, %v902_v47, 0.0  ;;  %vm839_vm12 = vcmp.ge.u32.totalorder %v774_v62, %v1179_v13  ;;  %vm840_vm13 = vcmp.ge.u32.totalorder %v775_v0, %v1179_v13 }
  0xf9   :  { %1029 = vst [vmem:[#allocation7 + $0x1d0] sm:$0xff] %v965_v59  ;;  %1030 = vst [vmem:[#allocation7 + $0x1d8] sm:$0xff] %v966_v8  ;;  %v967_v51 = vsel %vm839_vm12, %v903_v63, 0.0  ;;  %v968_v60 = vsel %vm840_vm13, %v904_v3, 0.0  ;;  %vm841_vm14 = vcmp.ge.u32.totalorder %v776_v5, %v1179_v13  ;;  %vm842_vm15 = vcmp.ge.u32.totalorder %v777_v7, %v1179_v13 }
  0xfa   :  { %1031 = vst [vmem:[#allocation7 + $0x1e0] sm:$0xff] %v967_v51  ;;  %1032 = vst [vmem:[#allocation7 + $0x1e8] sm:$0xff] %v968_v60  ;;  %v969_v15 = vsel %vm841_vm14, %v905_v6, 0.0  ;;  %v970_v16 = vsel %vm842_vm15, %v906_v52, 0.0 }
  0xfb   :  { %1033 = vst [vmem:[#allocation7 + $0x1f0] sm:$0xff] %v969_v15  ;;  %1034 = vst [vmem:[#allocation7 + $0x1f8] sm:$0xff] %v970_v16 }
  0xfc   :  { %1101 = shalt.err (!%p1098_p1)
}
  0xfd   :  { %s1102_s11 = scalar_lea.hbm %s1465_s2, 8192 }
  0xfe   :  { %p1103_p2 = scmp.ne.s32.totalorder %s1465_s2, %s1102_s11  ;;  %p1106_p3 = scmp.lt.u32.totalorder %s1102_s11, %s1465_s2 }
 0x100   :  { %p1108_p4 = pnand %p1106_p3, %p1103_p2 }
 0x102   :  { %1111 = shalt.err (!%p1108_p4)
}
 0x103   :  { %1046 = dma.vmem_to_hbm [thread:$0]  %s1041_s7, 8192, %s1465_s2, [#allocation6], %s1120_s28, %s1120_s28, %s1121_s29  }
 0x104   :  { %1116 = dma.done.wait [#allocation6], 8192  }
 0x105   :  { %1117 = vsyncadd [#allocation6], 4294959104 }
 0x106   :  { %1050 = vsyncpa [#allocation5], 1 }
 0x107   :  { %1051 = vsyncpa [#allocation6], 1 }

</bundles_post_ra>
